<compile_context>
chip_gen: v6e
topology: v6e:2x2x1
jax: 0.10.0
libtpu: 0.0.40
codegen_flags: <defaults>
</compile_context>

<pallas_src>
import functools

import jax
import jax.numpy as jnp
from jax.experimental import pallas as pl
from jax.experimental.pallas import tpu as pltpu


def _vae2_kernel(*refs, has_y):
    if has_y:
        (x_ref, y_ref, eps_ref,
         ew1, eb1, ew2, eb2, ew3, eb3, wmv, bmv,
         dw1, db1, dw2, db2, dw3, db3, dw4, db4,
         yprd_ref, rowloss_ref) = refs
    else:
        (x_ref, eps_ref,
         ew1, eb1, ew2, eb2, ew3, eb3, wmv, bmv,
         dw1, db1, dw2, db2, dw3, db3, dw4, db4,
         yprd_ref, rowloss_ref) = refs
        y_ref = x_ref      # standard VAE: reconstruction target == input

    f32 = jnp.float32
    bf16 = jnp.bfloat16
    D_z = eps_ref.shape[-1]

    # ---- encoder: Linear+ReLU x3 (bf16 matmuls, f32 MXU accumulation) ----
    x = x_ref[...]                                             # already bf16
    h1 = jnp.maximum(jnp.dot(x, ew1[...], preferred_element_type=f32) + eb1[...], 0.0)
    h2 = jnp.maximum(jnp.dot(h1.astype(bf16), ew2[...],
                             preferred_element_type=f32) + eb2[...], 0.0)
    h3 = jnp.maximum(jnp.dot(h2.astype(bf16), ew3[...],
                             preferred_element_type=f32) + eb3[...], 0.0)

    # ---- fused mean / log_var heads: one matmul, then lane-slice ----
    mv = jnp.dot(h3.astype(bf16), wmv[...], preferred_element_type=f32) + bmv[...]
    mean = mv[:, :D_z]
    log_var = mv[:, D_z:]

    # ---- reparameterization (training mode): z = eps * exp(0.5*log_var) + mean
    std = jnp.exp(0.5 * log_var)
    z = eps_ref[...].astype(f32) * std + mean

    # ---- decoder: Linear+ReLU x3, Linear -> logits ----
    d1 = jnp.maximum(jnp.dot(z.astype(bf16), dw1[...],
                             preferred_element_type=f32) + db1[...], 0.0)
    d2 = jnp.maximum(jnp.dot(d1.astype(bf16), dw2[...],
                             preferred_element_type=f32) + db2[...], 0.0)
    d3 = jnp.maximum(jnp.dot(d2.astype(bf16), dw3[...],
                             preferred_element_type=f32) + db3[...], 0.0)
    logits = jnp.dot(d3.astype(bf16), dw4[...],
                     preferred_element_type=f32) + db4[...]

    # ---- shared-exp epilogue: sigmoid and softplus from one exp(-|l|) ----
    e = jnp.exp(-jnp.abs(logits))                              # single EUP pass
    r = pl.reciprocal(1.0 + e, approx=True)
    y_prd = jnp.where(logits >= 0.0, r, e * r)                 # sigmoid(logits)
    yprd_ref[...] = y_prd.astype(yprd_ref.dtype)

    # BCE from logits (stable softplus form, == torch BCE with sum reduction):
    #   sum(softplus(l) - y*l) == -sum(y*log(p) + (1-y)*log(1-p)), p=sigmoid(l)
    yv = y_ref[...].astype(f32)
    softplus = jnp.maximum(logits, 0.0) + jnp.log1p(e)
    bce_rows = jnp.sum(softplus - yv * logits, axis=-1, keepdims=True)
    # KLD: -0.5 * sum(1 + log_var - mean^2 - exp(log_var));  exp(log_var)=std^2.
    kld_rows = -0.5 * jnp.sum(1.0 + log_var - mean * mean - std * std,
                              axis=-1, keepdims=True)
    rowloss_ref[...] = bce_rows + kld_rows


def _linear_params(key, fan_in, fan_out):
    # Deterministic stand-in for torch.nn.Linear default init:
    # U(-1/sqrt(fan_in), +1/sqrt(fan_in)) for both weight and bias.
    kw, kb = jax.random.split(key)
    bound = 1.0 / jnp.sqrt(jnp.float32(fan_in))
    w = jax.random.uniform(kw, (fan_in, fan_out), jnp.float32, -bound, bound)
    b = jax.random.uniform(kb, (1, fan_out), jnp.float32, -bound, bound)
    return w, b


def init_vae2_params(key, D_in, D_h1, D_h2, D_h3, D_z):
    keys = jax.random.split(key, 9)
    dims = [(D_in, D_h1), (D_h1, D_h2), (D_h2, D_h3),            # encoder trunk
            (D_h3, D_z), (D_h3, D_z),                            # mean_fc, log_var_fc
            (D_z, D_h3), (D_h3, D_h2), (D_h2, D_h1), (D_h1, D_in)]  # decoder
    params = []
    for k, (fi, fo) in zip(keys, dims):
        params.extend(_linear_params(k, fi, fo))
    return params  # flat list: [W, b, W, b, ...] (18 arrays, f32)


def vae2_forward(params, x_flat, eps, y=None, *,
                 block_rows=1024, vmem_limit_bytes=48 * 1024 * 1024):
    """Returns (y_prd, loss) like VAE2.forward(x, y) in training mode.

    y=None (or y is x_flat) is the standard VAE case (target == input); the
    kernel then reuses the x stream as the BCE target and skips a second
    (B, D_in) input entirely.  y_prd is returned in bf16 (cast outside if f32
    is required downstream).
    """
    B, D_in = x_flat.shape
    D_z = eps.shape[1]
    (ew1, eb1, ew2, eb2, ew3, eb3, wm, bm, wv, bv,
     dw1, db1, dw2, db2, dw3, db3, dw4, db4) = params

    bf16 = jnp.bfloat16
    # Fused mean/log_var head; weights in bf16, biases stay f32.
    wmv = jnp.concatenate([wm, wv], axis=1).astype(bf16)
    bmv = jnp.concatenate([bm, bv], axis=1)
    weights = [
        ew1.astype(bf16), eb1, ew2.astype(bf16), eb2, ew3.astype(bf16), eb3,
        wmv, bmv,
        dw1.astype(bf16), db1, dw2.astype(bf16), db2,
        dw3.astype(bf16), db3, dw4.astype(bf16), db4,
    ]

    has_y = (y is not None) and (y is not x_flat)

    # ---- batch tiling: no host-side padding; a partial last block is masked
    #      by Pallas and out_shape is exactly (B, ...), so nothing to slice.
    TB = B if B <= block_rows else block_rows
    nt = pl.cdiv(B, TB)

    data = [x_flat.astype(bf16)]
    data_specs = [pl.BlockSpec((TB, D_in), lambda i: (i, 0))]
    if has_y:
        data.append(y.astype(bf16))
        data_specs.append(pl.BlockSpec((TB, D_in), lambda i: (i, 0)))
    data.append(eps.astype(bf16))
    data_specs.append(pl.BlockSpec((TB, D_z), lambda i: (i, 0)))

    # Full-extent blocks with constant index maps: DMA'd once, VMEM-resident.
    weight_specs = [pl.BlockSpec(w.shape, lambda i: (0, 0)) for w in weights]

    y_prd, row_loss = pl.pallas_call(
        functools.partial(_vae2_kernel, has_y=has_y),
        grid=(nt,),
        out_shape=(jax.ShapeDtypeStruct((B, D_in), bf16),
                   jax.ShapeDtypeStruct((B, 1), jnp.float32)),
        in_specs=data_specs + weight_specs,
        out_specs=(pl.BlockSpec((TB, D_in), lambda i: (i, 0)),
                   pl.BlockSpec((TB, 1), lambda i: (i, 0))),
        compiler_params=pltpu.CompilerParams(
            dimension_semantics=("parallel",),
            vmem_limit_bytes=vmem_limit_bytes),
    )(*data, *weights)

    loss = jnp.sum(row_loss[:, 0])
    return y_prd, loss


def _reference_forward(params, x_flat, y, eps):
    """Pure-JAX mirror of the kernel (same bf16 weight/activation policy)."""
    (ew1, eb1, ew2, eb2, ew3, eb3, wm, bm, wv, bv,
     dw1, db1, dw2, db2, dw3, db3, dw4, db4) = params
    f32, bf16 = jnp.float32, jnp.bfloat16

    def lin(h, w, b):
        return jnp.dot(h.astype(bf16), w.astype(bf16),
                       preferred_element_type=f32) + b

    xb = x_flat.astype(bf16).astype(f32)
    yb = y.astype(bf16).astype(f32)
    eb = eps.astype(bf16).astype(f32)
    h = jnp.maximum(lin(xb, ew1, eb1), 0.0)
    h = jnp.maximum(lin(h, ew2, eb2), 0.0)
    h = jnp.maximum(lin(h, ew3, eb3), 0.0)
    mean = lin(h, wm, bm)
    log_var = lin(h, wv, bv)
    z = eb * jnp.exp(0.5 * log_var) + mean
    d = jnp.maximum(lin(z, dw1, db1), 0.0)
    d = jnp.maximum(lin(d, dw2, db2), 0.0)
    d = jnp.maximum(lin(d, dw3, db3), 0.0)
    logits = lin(d, dw4, db4)
    y_prd = jax.nn.sigmoid(logits)
    softplus = jnp.maximum(logits, 0.0) + jnp.log1p(jnp.exp(-jnp.abs(logits)))
    bce = jnp.sum(softplus - yb * logits)
    kld = -0.5 * jnp.sum(1.0 + log_var - mean * mean - jnp.exp(log_var))
    return y_prd, bce + kld


if __name__ == "__main__":
    # Small shapes consistent with the module: image x of [B, C, H, W] is
    # flattened (VAE2.preprocess) into the D_in vector the encoder consumes.
    B, C, H, W = 2, 4, 16, 16
    D_in = C * H * W            # 1024
    D_h1, D_h2, D_h3, D_z = 256, 128, 64, 32

    key = jax.random.PRNGKey(0)
    k_params, k_x, k_eps = jax.random.split(key, 3)

    params = init_vae2_params(k_params, D_in, D_h1, D_h2, D_h3, D_z)

    x_img = jax.random.uniform(k_x, (B, C, H, W), jnp.float32)   # pixels in [0, 1]
    x_flat = x_img.reshape(B, -1)                                # flatten() glue
    # TODO(synk): noise uses jax.random.normal; cannot bit-match torch.randn_like RNG.
    eps = jax.random.normal(k_eps, (B, D_z), jnp.float32)

    # Standard VAE usage: target y == input x (no separate y stream needed).
    y_prd, loss = jax.jit(vae2_forward)(params, x_flat, eps)
    jax.block_until_ready((y_prd, loss))

    # correctness: finite + close to the pure-JAX reference
    y_ref, loss_ref = _reference_forward(params, x_flat, x_flat, eps)
    y_prd_f32 = y_prd.astype(jnp.float32)
    assert y_prd.shape == (B, D_in)
    assert bool(jnp.all(jnp.isfinite(y_prd_f32))) and bool(jnp.isfinite(loss))
    assert bool(jnp.allclose(y_prd_f32, y_ref, atol=2e-2, rtol=2e-2))
    assert float(jnp.abs(loss - loss_ref)) <= 2e-2 * float(jnp.abs(loss_ref)) + 1e-2
    print("KERNEL_OK")
</pallas_src>

<mosaic_0001>
module attributes {stable_mosaic.version = 11 : i64} {
  func.func @_vae2_kernel(%arg0: i32, %arg1: memref<2x1024xbf16, #tpu.memory_space<vmem>>, %arg2: memref<2x32xbf16, #tpu.memory_space<vmem>>, %arg3: memref<1024x256xbf16, #tpu.memory_space<vmem>>, %arg4: memref<1x256xf32, #tpu.memory_space<vmem>>, %arg5: memref<256x128xbf16, #tpu.memory_space<vmem>>, %arg6: memref<1x128xf32, #tpu.memory_space<vmem>>, %arg7: memref<128x64xbf16, #tpu.memory_space<vmem>>, %arg8: memref<1x64xf32, #tpu.memory_space<vmem>>, %arg9: memref<64x64xbf16, #tpu.memory_space<vmem>>, %arg10: memref<1x64xf32, #tpu.memory_space<vmem>>, %arg11: memref<32x64xbf16, #tpu.memory_space<vmem>>, %arg12: memref<1x64xf32, #tpu.memory_space<vmem>>, %arg13: memref<64x128xbf16, #tpu.memory_space<vmem>>, %arg14: memref<1x128xf32, #tpu.memory_space<vmem>>, %arg15: memref<128x256xbf16, #tpu.memory_space<vmem>>, %arg16: memref<1x256xf32, #tpu.memory_space<vmem>>, %arg17: memref<256x1024xbf16, #tpu.memory_space<vmem>>, %arg18: memref<1x1024xf32, #tpu.memory_space<vmem>>, %arg19: memref<2x1024xbf16, #tpu.memory_space<vmem>>, %arg20: memref<2x1xf32, #tpu.memory_space<vmem>>) attributes {dimension_semantics = [#tpu.dimension_semantics<parallel>], iteration_bounds = array<i64: 1>, scalar_prefetch = 0 : i64, scratch_operands = 0 : i64, tpu.core_type = #tpu.core_type<tc>, window_params = [{transform_indices = @transform_0, window_bounds = array<i64: 2, 1024>}, {transform_indices = @transform_1, window_bounds = array<i64: 2, 32>}, {pipeline_mode = #tpu.pipeline_mode<synchronous>, transform_indices = @transform_2, window_bounds = array<i64: 1024, 256>}, {pipeline_mode = #tpu.pipeline_mode<synchronous>, transform_indices = @transform_3, window_bounds = array<i64: 1, 256>}, {pipeline_mode = #tpu.pipeline_mode<synchronous>, transform_indices = @transform_4, window_bounds = array<i64: 256, 128>}, {pipeline_mode = #tpu.pipeline_mode<synchronous>, transform_indices = @transform_5, window_bounds = array<i64: 1, 128>}, {pipeline_mode = #tpu.pipeline_mode<synchronous>, transform_indices = @transform_6, window_bounds = array<i64: 128, 64>}, {pipeline_mode = #tpu.pipeline_mode<synchronous>, transform_indices = @transform_7, window_bounds = array<i64: 1, 64>}, {pipeline_mode = #tpu.pipeline_mode<synchronous>, transform_indices = @transform_8, window_bounds = array<i64: 64, 64>}, {pipeline_mode = #tpu.pipeline_mode<synchronous>, transform_indices = @transform_9, window_bounds = array<i64: 1, 64>}, {pipeline_mode = #tpu.pipeline_mode<synchronous>, transform_indices = @transform_10, window_bounds = array<i64: 32, 64>}, {pipeline_mode = #tpu.pipeline_mode<synchronous>, transform_indices = @transform_11, window_bounds = array<i64: 1, 64>}, {pipeline_mode = #tpu.pipeline_mode<synchronous>, transform_indices = @transform_12, window_bounds = array<i64: 64, 128>}, {pipeline_mode = #tpu.pipeline_mode<synchronous>, transform_indices = @transform_13, window_bounds = array<i64: 1, 128>}, {pipeline_mode = #tpu.pipeline_mode<synchronous>, transform_indices = @transform_14, window_bounds = array<i64: 128, 256>}, {pipeline_mode = #tpu.pipeline_mode<synchronous>, transform_indices = @transform_15, window_bounds = array<i64: 1, 256>}, {pipeline_mode = #tpu.pipeline_mode<synchronous>, transform_indices = @transform_16, window_bounds = array<i64: 256, 1024>}, {pipeline_mode = #tpu.pipeline_mode<synchronous>, transform_indices = @transform_17, window_bounds = array<i64: 1, 1024>}, {transform_indices = @transform_18, window_bounds = array<i64: 2, 1024>}, {transform_indices = @transform_19, window_bounds = array<i64: 2, 1>}]} {
    %c0 = arith.constant 0 : index
    %c0_0 = arith.constant 0 : index
    %0 = vector.load %arg1[%c0, %c0_0] : memref<2x1024xbf16, #tpu.memory_space<vmem>>, vector<2x1024xbf16>
    %c0_1 = arith.constant 0 : index
    %c0_2 = arith.constant 0 : index
    %1 = vector.load %arg3[%c0_1, %c0_2] : memref<1024x256xbf16, #tpu.memory_space<vmem>>, vector<1024x256xbf16>
    %cst = arith.constant dense<0.000000e+00> : vector<2x256xf32>
    %2 = tpu.matmul %0, %1, %cst {dimension_numbers = #tpu.dot_dimension_numbers<[1], [0], [0], [1], [0, 0, 1, 1], [], []>} : vector<2x1024xbf16>, vector<1024x256xbf16>, vector<2x256xf32> -> vector<2x256xf32>
    %c0_3 = arith.constant 0 : index
    %c0_4 = arith.constant 0 : index
    %3 = vector.load %arg4[%c0_3, %c0_4] : memref<1x256xf32, #tpu.memory_space<vmem>>, vector<1x256xf32>
    %4 = vector.broadcast %3 : vector<1x256xf32> to vector<2x256xf32>
    %5 = arith.addf %2, %4 : vector<2x256xf32>
    %cst_5 = arith.constant 0.000000e+00 : f32
    %6 = vector.broadcast %cst_5 : f32 to vector<2x256xf32>
    %7 = arith.maximumf %5, %6 : vector<2x256xf32>
    %8 = arith.truncf %7 : vector<2x256xf32> to vector<2x256xbf16>
    %c0_6 = arith.constant 0 : index
    %c0_7 = arith.constant 0 : index
    %9 = vector.load %arg5[%c0_6, %c0_7] : memref<256x128xbf16, #tpu.memory_space<vmem>>, vector<256x128xbf16>
    %cst_8 = arith.constant dense<0.000000e+00> : vector<2x128xf32>
    %10 = tpu.matmul %8, %9, %cst_8 {dimension_numbers = #tpu.dot_dimension_numbers<[1], [0], [0], [1], [0, 0, 1, 1], [], []>} : vector<2x256xbf16>, vector<256x128xbf16>, vector<2x128xf32> -> vector<2x128xf32>
    %c0_9 = arith.constant 0 : index
    %c0_10 = arith.constant 0 : index
    %11 = vector.load %arg6[%c0_9, %c0_10] : memref<1x128xf32, #tpu.memory_space<vmem>>, vector<1x128xf32>
    %12 = vector.broadcast %11 : vector<1x128xf32> to vector<2x128xf32>
    %13 = arith.addf %10, %12 : vector<2x128xf32>
    %cst_11 = arith.constant 0.000000e+00 : f32
    %14 = vector.broadcast %cst_11 : f32 to vector<2x128xf32>
    %15 = arith.maximumf %13, %14 : vector<2x128xf32>
    %16 = arith.truncf %15 : vector<2x128xf32> to vector<2x128xbf16>
    %c0_12 = arith.constant 0 : index
    %c0_13 = arith.constant 0 : index
    %17 = vector.load %arg7[%c0_12, %c0_13] : memref<128x64xbf16, #tpu.memory_space<vmem>>, vector<128x64xbf16>
    %cst_14 = arith.constant dense<0.000000e+00> : vector<2x64xf32>
    %18 = tpu.matmul %16, %17, %cst_14 {dimension_numbers = #tpu.dot_dimension_numbers<[1], [0], [0], [1], [0, 0, 1, 1], [], []>} : vector<2x128xbf16>, vector<128x64xbf16>, vector<2x64xf32> -> vector<2x64xf32>
    %c0_15 = arith.constant 0 : index
    %c0_16 = arith.constant 0 : index
    %19 = vector.load %arg8[%c0_15, %c0_16] : memref<1x64xf32, #tpu.memory_space<vmem>>, vector<1x64xf32>
    %20 = vector.broadcast %19 : vector<1x64xf32> to vector<2x64xf32>
    %21 = arith.addf %18, %20 : vector<2x64xf32>
    %cst_17 = arith.constant 0.000000e+00 : f32
    %22 = vector.broadcast %cst_17 : f32 to vector<2x64xf32>
    %23 = arith.maximumf %21, %22 : vector<2x64xf32>
    %24 = arith.truncf %23 : vector<2x64xf32> to vector<2x64xbf16>
    %c0_18 = arith.constant 0 : index
    %c0_19 = arith.constant 0 : index
    %25 = vector.load %arg9[%c0_18, %c0_19] : memref<64x64xbf16, #tpu.memory_space<vmem>>, vector<64x64xbf16>
    %cst_20 = arith.constant dense<0.000000e+00> : vector<2x64xf32>
    %26 = tpu.matmul %24, %25, %cst_20 {dimension_numbers = #tpu.dot_dimension_numbers<[1], [0], [0], [1], [0, 0, 1, 1], [], []>} : vector<2x64xbf16>, vector<64x64xbf16>, vector<2x64xf32> -> vector<2x64xf32>
    %c0_21 = arith.constant 0 : index
    %c0_22 = arith.constant 0 : index
    %27 = vector.load %arg10[%c0_21, %c0_22] : memref<1x64xf32, #tpu.memory_space<vmem>>, vector<1x64xf32>
    %28 = vector.broadcast %27 : vector<1x64xf32> to vector<2x64xf32>
    %29 = arith.addf %26, %28 : vector<2x64xf32>
    %30 = vector.extract_strided_slice %29 {offsets = [0, 0], sizes = [2, 32], strides = [1, 1]} : vector<2x64xf32> to vector<2x32xf32>
    %31 = vector.extract_strided_slice %29 {offsets = [0, 32], sizes = [2, 32], strides = [1, 1]} : vector<2x64xf32> to vector<2x32xf32>
    %cst_23 = arith.constant 5.000000e-01 : f32
    %32 = vector.broadcast %cst_23 : f32 to vector<2x32xf32>
    %33 = arith.mulf %32, %31 : vector<2x32xf32>
    %34 = math.exp %33 : vector<2x32xf32>
    %c0_24 = arith.constant 0 : index
    %c0_25 = arith.constant 0 : index
    %35 = vector.load %arg2[%c0_24, %c0_25] : memref<2x32xbf16, #tpu.memory_space<vmem>>, vector<2x32xbf16>
    %36 = arith.extf %35 : vector<2x32xbf16> to vector<2x32xf32>
    %37 = arith.mulf %36, %34 : vector<2x32xf32>
    %38 = arith.addf %37, %30 : vector<2x32xf32>
    %39 = arith.truncf %38 : vector<2x32xf32> to vector<2x32xbf16>
    %c0_26 = arith.constant 0 : index
    %c0_27 = arith.constant 0 : index
    %40 = vector.load %arg11[%c0_26, %c0_27] : memref<32x64xbf16, #tpu.memory_space<vmem>>, vector<32x64xbf16>
    %cst_28 = arith.constant dense<0.000000e+00> : vector<2x64xf32>
    %41 = tpu.matmul %39, %40, %cst_28 {dimension_numbers = #tpu.dot_dimension_numbers<[1], [0], [0], [1], [0, 0, 1, 1], [], []>} : vector<2x32xbf16>, vector<32x64xbf16>, vector<2x64xf32> -> vector<2x64xf32>
    %c0_29 = arith.constant 0 : index
    %c0_30 = arith.constant 0 : index
    %42 = vector.load %arg12[%c0_29, %c0_30] : memref<1x64xf32, #tpu.memory_space<vmem>>, vector<1x64xf32>
    %43 = vector.broadcast %42 : vector<1x64xf32> to vector<2x64xf32>
    %44 = arith.addf %41, %43 : vector<2x64xf32>
    %cst_31 = arith.constant 0.000000e+00 : f32
    %45 = vector.broadcast %cst_31 : f32 to vector<2x64xf32>
    %46 = arith.maximumf %44, %45 : vector<2x64xf32>
    %47 = arith.truncf %46 : vector<2x64xf32> to vector<2x64xbf16>
    %c0_32 = arith.constant 0 : index
    %c0_33 = arith.constant 0 : index
    %48 = vector.load %arg13[%c0_32, %c0_33] : memref<64x128xbf16, #tpu.memory_space<vmem>>, vector<64x128xbf16>
    %cst_34 = arith.constant dense<0.000000e+00> : vector<2x128xf32>
    %49 = tpu.matmul %47, %48, %cst_34 {dimension_numbers = #tpu.dot_dimension_numbers<[1], [0], [0], [1], [0, 0, 1, 1], [], []>} : vector<2x64xbf16>, vector<64x128xbf16>, vector<2x128xf32> -> vector<2x128xf32>
    %c0_35 = arith.constant 0 : index
    %c0_36 = arith.constant 0 : index
    %50 = vector.load %arg14[%c0_35, %c0_36] : memref<1x128xf32, #tpu.memory_space<vmem>>, vector<1x128xf32>
    %51 = vector.broadcast %50 : vector<1x128xf32> to vector<2x128xf32>
    %52 = arith.addf %49, %51 : vector<2x128xf32>
    %cst_37 = arith.constant 0.000000e+00 : f32
    %53 = vector.broadcast %cst_37 : f32 to vector<2x128xf32>
    %54 = arith.maximumf %52, %53 : vector<2x128xf32>
    %55 = arith.truncf %54 : vector<2x128xf32> to vector<2x128xbf16>
    %c0_38 = arith.constant 0 : index
    %c0_39 = arith.constant 0 : index
    %56 = vector.load %arg15[%c0_38, %c0_39] : memref<128x256xbf16, #tpu.memory_space<vmem>>, vector<128x256xbf16>
    %cst_40 = arith.constant dense<0.000000e+00> : vector<2x256xf32>
    %57 = tpu.matmul %55, %56, %cst_40 {dimension_numbers = #tpu.dot_dimension_numbers<[1], [0], [0], [1], [0, 0, 1, 1], [], []>} : vector<2x128xbf16>, vector<128x256xbf16>, vector<2x256xf32> -> vector<2x256xf32>
    %c0_41 = arith.constant 0 : index
    %c0_42 = arith.constant 0 : index
    %58 = vector.load %arg16[%c0_41, %c0_42] : memref<1x256xf32, #tpu.memory_space<vmem>>, vector<1x256xf32>
    %59 = vector.broadcast %58 : vector<1x256xf32> to vector<2x256xf32>
    %60 = arith.addf %57, %59 : vector<2x256xf32>
    %cst_43 = arith.constant 0.000000e+00 : f32
    %61 = vector.broadcast %cst_43 : f32 to vector<2x256xf32>
    %62 = arith.maximumf %60, %61 : vector<2x256xf32>
    %63 = arith.truncf %62 : vector<2x256xf32> to vector<2x256xbf16>
    %c0_44 = arith.constant 0 : index
    %c0_45 = arith.constant 0 : index
    %64 = vector.load %arg17[%c0_44, %c0_45] : memref<256x1024xbf16, #tpu.memory_space<vmem>>, vector<256x1024xbf16>
    %cst_46 = arith.constant dense<0.000000e+00> : vector<2x1024xf32>
    %65 = tpu.matmul %63, %64, %cst_46 {dimension_numbers = #tpu.dot_dimension_numbers<[1], [0], [0], [1], [0, 0, 1, 1], [], []>} : vector<2x256xbf16>, vector<256x1024xbf16>, vector<2x1024xf32> -> vector<2x1024xf32>
    %c0_47 = arith.constant 0 : index
    %c0_48 = arith.constant 0 : index
    %66 = vector.load %arg18[%c0_47, %c0_48] : memref<1x1024xf32, #tpu.memory_space<vmem>>, vector<1x1024xf32>
    %67 = vector.broadcast %66 : vector<1x1024xf32> to vector<2x1024xf32>
    %68 = arith.addf %65, %67 : vector<2x1024xf32>
    %69 = math.absf %68 : vector<2x1024xf32>
    %cst_49 = arith.constant 0.000000e+00 : f32
    %70 = vector.broadcast %cst_49 : f32 to vector<2x1024xf32>
    %71 = arith.subf %70, %69 : vector<2x1024xf32>
    %72 = math.exp %71 : vector<2x1024xf32>
    %cst_50 = arith.constant 1.000000e+00 : f32
    %73 = vector.broadcast %cst_50 : f32 to vector<2x1024xf32>
    %74 = arith.addf %73, %72 : vector<2x1024xf32>
    %75 = tpu.reciprocal %74 {approx = true} : vector<2x1024xf32> -> vector<2x1024xf32>
    %cst_51 = arith.constant 0.000000e+00 : f32
    %76 = vector.broadcast %cst_51 : f32 to vector<2x1024xf32>
    %77 = arith.cmpf oge, %68, %76 : vector<2x1024xf32>
    %78 = arith.mulf %72, %75 : vector<2x1024xf32>
    %79 = arith.select %77, %75, %78 : vector<2x1024xi1>, vector<2x1024xf32>
    %80 = arith.truncf %79 : vector<2x1024xf32> to vector<2x1024xbf16>
    %c0_52 = arith.constant 0 : index
    %c0_53 = arith.constant 0 : index
    %81 = vector.load %arg19[%c0_52, %c0_53] : memref<2x1024xbf16, #tpu.memory_space<vmem>>, vector<2x1024xbf16>
    tpu.vector_store %arg19[%c0_52, %c0_53], %80 {strides = array<i32>} : memref<2x1024xbf16, #tpu.memory_space<vmem>>, vector<2x1024xbf16>,
    %c0_54 = arith.constant 0 : index
    %c0_55 = arith.constant 0 : index
    %82 = vector.load %arg1[%c0_54, %c0_55] : memref<2x1024xbf16, #tpu.memory_space<vmem>>, vector<2x1024xbf16>
    %83 = arith.extf %82 : vector<2x1024xbf16> to vector<2x1024xf32>
    %cst_56 = arith.constant 0.000000e+00 : f32
    %84 = vector.broadcast %cst_56 : f32 to vector<2x1024xf32>
    %85 = arith.maximumf %68, %84 : vector<2x1024xf32>
    %86 = math.log1p %72 : vector<2x1024xf32>
    %87 = arith.addf %85, %86 : vector<2x1024xf32>
    %88 = arith.mulf %83, %68 : vector<2x1024xf32>
    %89 = arith.subf %87, %88 : vector<2x1024xf32>
    %cst_57 = arith.constant dense<0.000000e+00> : vector<2xf32>
    %90 = vector.multi_reduction <add>, %89, %cst_57 [1] : vector<2x1024xf32> to vector<2xf32>
    %91 = vector.shape_cast %90 : vector<2xf32> to vector<2x1xf32>
    %cst_58 = arith.constant 1.000000e+00 : f32
    %92 = vector.broadcast %cst_58 : f32 to vector<2x32xf32>
    %93 = arith.addf %92, %31 : vector<2x32xf32>
    %94 = arith.mulf %30, %30 : vector<2x32xf32>
    %95 = arith.subf %93, %94 : vector<2x32xf32>
    %96 = arith.mulf %34, %34 : vector<2x32xf32>
    %97 = arith.subf %95, %96 : vector<2x32xf32>
    %cst_59 = arith.constant dense<0.000000e+00> : vector<2xf32>
    %98 = vector.multi_reduction <add>, %97, %cst_59 [1] : vector<2x32xf32> to vector<2xf32>
    %99 = vector.shape_cast %98 : vector<2xf32> to vector<2x1xf32>
    %cst_60 = arith.constant -5.000000e-01 : f32
    %100 = vector.broadcast %cst_60 : f32 to vector<2x1xf32>
    %101 = arith.mulf %100, %99 : vector<2x1xf32>
    %102 = arith.addf %91, %101 : vector<2x1xf32>
    %c0_61 = arith.constant 0 : index
    %c0_62 = arith.constant 0 : index
    %103 = vector.load %arg20[%c0_61, %c0_62] : memref<2x1xf32, #tpu.memory_space<vmem>>, vector<2x1xf32>
    tpu.vector_store %arg20[%c0_61, %c0_62], %102 {strides = array<i32>} : memref<2x1xf32, #tpu.memory_space<vmem>>, vector<2x1xf32>,
    return
  }
  func.func @transform_0(%arg0: i32) -> (i32, i32) {
    %c0_i32 = arith.constant 0 : i32
    %c0_i32_0 = arith.constant 0 : i32
    return %arg0, %c0_i32 : i32, i32
  }
  func.func @transform_1(%arg0: i32) -> (i32, i32) {
    %c0_i32 = arith.constant 0 : i32
    %c0_i32_0 = arith.constant 0 : i32
    return %arg0, %c0_i32 : i32, i32
  }
  func.func @transform_2(%arg0: i32) -> (i32, i32) {
    %c0_i32 = arith.constant 0 : i32
    %c0_i32_0 = arith.constant 0 : i32
    %c0_i32_1 = arith.constant 0 : i32
    return %c0_i32, %c0_i32_0 : i32, i32
  }
  func.func @transform_3(%arg0: i32) -> (i32, i32) {
    %c0_i32 = arith.constant 0 : i32
    %c0_i32_0 = arith.constant 0 : i32
    %c0_i32_1 = arith.constant 0 : i32
    return %c0_i32, %c0_i32_0 : i32, i32
  }
  func.func @transform_4(%arg0: i32) -> (i32, i32) {
    %c0_i32 = arith.constant 0 : i32
    %c0_i32_0 = arith.constant 0 : i32
    %c0_i32_1 = arith.constant 0 : i32
    return %c0_i32, %c0_i32_0 : i32, i32
  }
  func.func @transform_5(%arg0: i32) -> (i32, i32) {
    %c0_i32 = arith.constant 0 : i32
    %c0_i32_0 = arith.constant 0 : i32
    %c0_i32_1 = arith.constant 0 : i32
    return %c0_i32, %c0_i32_0 : i32, i32
  }
  func.func @transform_6(%arg0: i32) -> (i32, i32) {
    %c0_i32 = arith.constant 0 : i32
    %c0_i32_0 = arith.constant 0 : i32
    %c0_i32_1 = arith.constant 0 : i32
    return %c0_i32, %c0_i32_0 : i32, i32
  }
  func.func @transform_7(%arg0: i32) -> (i32, i32) {
    %c0_i32 = arith.constant 0 : i32
    %c0_i32_0 = arith.constant 0 : i32
    %c0_i32_1 = arith.constant 0 : i32
    return %c0_i32, %c0_i32_0 : i32, i32
  }
  func.func @transform_8(%arg0: i32) -> (i32, i32) {
    %c0_i32 = arith.constant 0 : i32
    %c0_i32_0 = arith.constant 0 : i32
    %c0_i32_1 = arith.constant 0 : i32
    return %c0_i32, %c0_i32_0 : i32, i32
  }
  func.func @transform_9(%arg0: i32) -> (i32, i32) {
    %c0_i32 = arith.constant 0 : i32
    %c0_i32_0 = arith.constant 0 : i32
    %c0_i32_1 = arith.constant 0 : i32
    return %c0_i32, %c0_i32_0 : i32, i32
  }
  func.func @transform_10(%arg0: i32) -> (i32, i32) {
    %c0_i32 = arith.constant 0 : i32
    %c0_i32_0 = arith.constant 0 : i32
    %c0_i32_1 = arith.constant 0 : i32
    return %c0_i32, %c0_i32_0 : i32, i32
  }
  func.func @transform_11(%arg0: i32) -> (i32, i32) {
    %c0_i32 = arith.constant 0 : i32
    %c0_i32_0 = arith.constant 0 : i32
    %c0_i32_1 = arith.constant 0 : i32
    return %c0_i32, %c0_i32_0 : i32, i32
  }
  func.func @transform_12(%arg0: i32) -> (i32, i32) {
    %c0_i32 = arith.constant 0 : i32
    %c0_i32_0 = arith.constant 0 : i32
    %c0_i32_1 = arith.constant 0 : i32
    return %c0_i32, %c0_i32_0 : i32, i32
  }
  func.func @transform_13(%arg0: i32) -> (i32, i32) {
    %c0_i32 = arith.constant 0 : i32
    %c0_i32_0 = arith.constant 0 : i32
    %c0_i32_1 = arith.constant 0 : i32
    return %c0_i32, %c0_i32_0 : i32, i32
  }
  func.func @transform_14(%arg0: i32) -> (i32, i32) {
    %c0_i32 = arith.constant 0 : i32
    %c0_i32_0 = arith.constant 0 : i32
    %c0_i32_1 = arith.constant 0 : i32
    return %c0_i32, %c0_i32_0 : i32, i32
  }
  func.func @transform_15(%arg0: i32) -> (i32, i32) {
    %c0_i32 = arith.constant 0 : i32
    %c0_i32_0 = arith.constant 0 : i32
    %c0_i32_1 = arith.constant 0 : i32
    return %c0_i32, %c0_i32_0 : i32, i32
  }
  func.func @transform_16(%arg0: i32) -> (i32, i32) {
    %c0_i32 = arith.constant 0 : i32
    %c0_i32_0 = arith.constant 0 : i32
    %c0_i32_1 = arith.constant 0 : i32
    return %c0_i32, %c0_i32_0 : i32, i32
  }
  func.func @transform_17(%arg0: i32) -> (i32, i32) {
    %c0_i32 = arith.constant 0 : i32
    %c0_i32_0 = arith.constant 0 : i32
    %c0_i32_1 = arith.constant 0 : i32
    return %c0_i32, %c0_i32_0 : i32, i32
  }
  func.func @transform_18(%arg0: i32) -> (i32, i32) {
    %c0_i32 = arith.constant 0 : i32
    %c0_i32_0 = arith.constant 0 : i32
    return %arg0, %c0_i32 : i32, i32
  }
  func.func @transform_19(%arg0: i32) -> (i32, i32) {
    %c0_i32 = arith.constant 0 : i32
    %c0_i32_0 = arith.constant 0 : i32
    return %arg0, %c0_i32 : i32, i32
  }
}

</mosaic_0001>

<bundles_post_ra>
// kernel: vae2_forward.1
= control target key start
LH: loop header
LB: loop body
LE: loop exit
PB: predicated region body
PF: predicated region fallthrough
CT: control target
= control target key end

     0   :  { %s5217_s0 = inlined_call_operand.vmem [shape: bf16[2,1024], index: 0, kind: input, shape index: {}]   ;;  %s5218_s1 = inlined_call_operand.vmem [shape: bf16[2,32], index: 1, kind: input, shape index: {}]   ;;  %s5219_s2 = inlined_call_operand.vmem [shape: bf16[1024,256], index: 2, kind: input, shape index: {}]   ;;  %s5220_s3 = inlined_call_operand.vmem [shape: f32[1,256], index: 3, kind: input, shape index: {}]   ;;  %s5221_s4 = inlined_call_operand.vmem [shape: bf16[256,128], index: 4, kind: input, shape index: {}]   ;;  %s5222_s5 = inlined_call_operand.vmem [shape: f32[1,128], index: 5, kind: input, shape index: {}]   ;;  %s5223_s6 = inlined_call_operand.vmem [shape: bf16[128,64], index: 6, kind: input, shape index: {}]   ;;  %s5224_s7 = inlined_call_operand.vmem [shape: f32[1,64], index: 7, kind: input, shape index: {}]   ;;  %s5225_s8 = inlined_call_operand.vmem [shape: bf16[64,64], index: 8, kind: input, shape index: {}]   ;;  %s5226_s9 = inlined_call_operand.vmem [shape: f32[1,64], index: 9, kind: input, shape index: {}]   ;;  %s5227_s10 = inlined_call_operand.vmem [shape: bf16[32,64], index: 10, kind: input, shape index: {}]   ;;  %s5228_s11 = inlined_call_operand.vmem [shape: f32[1,64], index: 11, kind: input, shape index: {}]   ;;  %s5229_s12 = inlined_call_operand.vmem [shape: bf16[64,128], index: 12, kind: input, shape index: {}]   ;;  %s5230_s13 = inlined_call_operand.vmem [shape: f32[1,128], index: 13, kind: input, shape index: {}]   ;;  %s5231_s14 = inlined_call_operand.vmem [shape: bf16[128,256], index: 14, kind: input, shape index: {}]   ;;  %s5232_s15 = inlined_call_operand.vmem [shape: f32[1,256], index: 15, kind: input, shape index: {}]   ;;  %s5233_s16 = inlined_call_operand.vmem [shape: bf16[256,1024], index: 16, kind: input, shape index: {}]   ;;  %s5234_s17 = inlined_call_operand.vmem [shape: f32[1,1024], index: 17, kind: input, shape index: {}]   ;;  %s5235_s18 = inlined_call_operand.hbm [shape: bf16[2,1024], index: 18, kind: output, shape index: {0}]   ;;  %s5236_s19 = inlined_call_operand.vmem [shape: f32[2,1], index: 19, kind: output, shape index: {1}]  }
   0x1   :  { %5239 = sst [smem:[#allocation5_spill]] %s5217_s0 }
   0x2   :  { %5240 = sst [smem:[#allocation6_spill]] %s5218_s1 }
   0x3   :  { %5241 = sst [smem:[#allocation7_spill]] %s5219_s2 }
   0x4   :  { %5242 = sst [smem:[#allocation8_spill]] %s5220_s3 }
   0x5   :  { %s5243_s20 = sld [smem:[#allocation7_spill]]  ;;  %v194_v36 = vlaneseq  ;;  %v3872_v37 = vmov 1966171168  }
   0x6   :  { %v207_v38 = vunpack.c.l.s4 %v3872_v37  ;;  %s5244_s26 = sld [smem:[#allocation5_spill]] }
   0x7   :  { %v4097_v42 = vshrl.u32 %v194_v36, 7 }
   0x8   :  { %v208_v43 = vunpack.c.0.s8 %v207_v38 }
   0xa   :  { %v4115_v49 = vsub.s32 %v208_v43, %v4097_v42 }
   0xb   :  { %v3549_v0 = vld [vmem:[%s5243_s20 + $0x74] ss:$8 sps:$4 sm:$0xff]   ;;  %v3553_v2 = vld [vmem:[%s5243_s20 + $0x70] ss:$8 sps:$4 sm:$0xff]   ;;  %v3555_v4 = vld [vmem:[%s5243_s20 + $0x64] ss:$8 sps:$4 sm:$0xff]  }
   0xc   :  { %v3551_v1 = vld [vmem:[%s5243_s20 + $0x174] ss:$8 sps:$4 sm:$0xff]   ;;  %902 = vmatprep.subr.bf16.mxu0 %v3549_v0  ;;  %v3554_v3 = vld [vmem:[%s5243_s20 + $0x170] ss:$8 sps:$4 sm:$0xff]   ;;  %v3557_v5 = vld [vmem:[%s5243_s20 + $0x164] ss:$8 sps:$4 sm:$0xff]  }
   0xd   :  { %943 = vmatprep.subr.bf16.mxu1 %v3551_v1  ;;  %903 = vmatpush1.bf16.msra.mxu0 %v3553_v2  ;;  %v3559_v6 = vld [vmem:[%s5243_s20 + $0x60] ss:$8 sps:$4 sm:$0xff]   ;;  %v3561_v8 = vld [vmem:[%s5243_s20 + $0x54] ss:$8 sps:$4 sm:$0xff]   ;;  %v3565_v10 = vld [vmem:[%s5243_s20 + $0x50] ss:$8 sps:$4 sm:$0xff]  }
   0xe   :  { %944 = vmatpush1.bf16.msra.mxu1 %v3554_v3  ;;  %904 = vmatprep.subr.bf16.mxu0 %v3555_v4  ;;  %v3560_v7 = vld [vmem:[%s5243_s20 + $0x160] ss:$8 sps:$4 sm:$0xff]   ;;  %v3563_v9 = vld [vmem:[%s5243_s20 + $0x154] ss:$8 sps:$4 sm:$0xff]   ;;  %v3566_v11 = vld [vmem:[%s5243_s20 + $0x150] ss:$8 sps:$4 sm:$0xff]  }
   0xf   :  { %945 = vmatprep.subr.bf16.mxu1 %v3557_v5  ;;  %v3567_v12 = vld [vmem:[%s5243_s20 + $0x44] ss:$8 sps:$4 sm:$0xff]   ;;  %v3571_v14 = vld [vmem:[%s5243_s20 + $0x40] ss:$8 sps:$4 sm:$0xff]   ;;  %v3573_v16 = vld [vmem:[%s5243_s20 + $0x34] ss:$8 sps:$4 sm:$0xff]  }
  0x10   :  { %v3569_v13 = vld [vmem:[%s5243_s20 + $0x144] ss:$8 sps:$4 sm:$0xff]   ;;  %v3572_v15 = vld [vmem:[%s5243_s20 + $0x140] ss:$8 sps:$4 sm:$0xff]   ;;  %v3575_v17 = vld [vmem:[%s5243_s20 + $0x134] ss:$8 sps:$4 sm:$0xff]  }
  0x11   :  { %905 = vmatpush1.bf16.msra.mxu0 %v3559_v6  ;;  %v3577_v18 = vld [vmem:[%s5243_s20 + $0x30] ss:$8 sps:$4 sm:$0xff]   ;;  %v3579_v20 = vld [vmem:[%s5243_s20 + $0x24] ss:$8 sps:$4 sm:$0xff]   ;;  %v3583_v22 = vld [vmem:[%s5243_s20 + $0x20] ss:$8 sps:$4 sm:$0xff]  }
  0x12   :  { %946 = vmatpush1.bf16.msra.mxu1 %v3560_v7  ;;  %906 = vmatprep.subr.bf16.mxu0 %v3561_v8  ;;  %v3578_v19 = vld [vmem:[%s5243_s20 + $0x130] ss:$8 sps:$4 sm:$0xff]   ;;  %v3581_v21 = vld [vmem:[%s5243_s20 + $0x124] ss:$8 sps:$4 sm:$0xff]   ;;  %v3584_v23 = vld [vmem:[%s5243_s20 + $0x120] ss:$8 sps:$4 sm:$0xff]  }
  0x13   :  { %947 = vmatprep.subr.bf16.mxu1 %v3563_v9  ;;  %v3585_v24 = vld [vmem:[%s5243_s20 + $0x14] ss:$8 sps:$4 sm:$0xff]   ;;  %v3589_v26 = vld [vmem:[%s5243_s20 + $0x10] ss:$8 sps:$4 sm:$0xff]   ;;  %v3591_v28 = vld [vmem:[%s5243_s20 + $0x4] ss:$8 sps:$4 sm:$0xff]  }
  0x14   :  { %v3587_v25 = vld [vmem:[%s5243_s20 + $0x114] ss:$8 sps:$4 sm:$0xff]   ;;  %v3590_v27 = vld [vmem:[%s5243_s20 + $0x110] ss:$8 sps:$4 sm:$0xff]   ;;  %v3593_v29 = vld [vmem:[%s5243_s20 + $0x104] ss:$8 sps:$4 sm:$0xff]  }
  0x15   :  { %907 = vmatpush1.bf16.msra.mxu0 %v3565_v10  ;;  %v3595_v30 = vld [vmem:[%s5243_s20] ss:$8 sps:$4 sm:$0xff]   ;;  %v3597_v32 = vld [vmem:[%s5243_s20 + $0xf4] ss:$8 sps:$4 sm:$0xff]   ;;  %v3601_v34 = vld [vmem:[%s5243_s20 + $0xf0] ss:$8 sps:$4 sm:$0xff]  }
  0x16   :  { %948 = vmatpush1.bf16.msra.mxu1 %v3566_v11  ;;  %908 = vmatprep.subr.bf16.mxu0 %v3567_v12  ;;  %v3596_v31 = vld [vmem:[%s5243_s20 + $0x100] ss:$8 sps:$4 sm:$0xff]   ;;  %v3599_v33 = vld [vmem:[%s5243_s20 + $0x1f4] ss:$8 sps:$4 sm:$0xff]   ;;  %v3602_v35 = vld [vmem:[%s5243_s20 + $0x1f0] ss:$8 sps:$4 sm:$0xff]  }
  0x17   :  { %949 = vmatprep.subr.bf16.mxu1 %v3569_v13  ;;  %v3603_v39 = vld [vmem:[%s5243_s20 + $0xe4] ss:$8 sps:$4 sm:$0xff]   ;;  %v3607_v41 = vld [vmem:[%s5243_s20 + $0xe0] ss:$8 sps:$4 sm:$0xff]   ;;  %v3609_v45 = vld [vmem:[%s5243_s20 + $0xd4] ss:$8 sps:$4 sm:$0xff]  }
  0x18   :  { %v3605_v40 = vld [vmem:[%s5243_s20 + $0x1e4] ss:$8 sps:$4 sm:$0xff]   ;;  %v3608_v44 = vld [vmem:[%s5243_s20 + $0x1e0] ss:$8 sps:$4 sm:$0xff]   ;;  %v3611_v46 = vld [vmem:[%s5243_s20 + $0x1d4] ss:$8 sps:$4 sm:$0xff]  }
  0x19   :  { %909 = vmatpush1.bf16.msra.mxu0 %v3571_v14  ;;  %v3613_v47 = vld [vmem:[%s5243_s20 + $0xd0] ss:$8 sps:$4 sm:$0xff]   ;;  %v3615_v50 = vld [vmem:[%s5243_s20 + $0xc4] ss:$8 sps:$4 sm:$0xff]   ;;  %v3619_v53 = vld [vmem:[%s5243_s20 + $0xc0] ss:$8 sps:$4 sm:$0xff]  }
  0x1a   :  { %950 = vmatpush1.bf16.msra.mxu1 %v3572_v15  ;;  %910 = vmatprep.subr.bf16.mxu0 %v3573_v16  ;;  %v3614_v48 = vld [vmem:[%s5243_s20 + $0x1d0] ss:$8 sps:$4 sm:$0xff]   ;;  %v3617_v51 = vld [vmem:[%s5243_s20 + $0x1c4] ss:$8 sps:$4 sm:$0xff]   ;;  %v3620_v55 = vld [vmem:[%s5243_s20 + $0x1c0] ss:$8 sps:$4 sm:$0xff]  }
  0x1b   :  { %951 = vmatprep.subr.bf16.mxu1 %v3575_v17  ;;  %v63_v52 = vld [vmem:[%s5244_s26] sm:$0xff]  ;;  %v3621_v56 = vld [vmem:[%s5243_s20 + $0xb4] ss:$8 sps:$4 sm:$0xff]   ;;  %v3625_v59 = vld [vmem:[%s5243_s20 + $0xb0] ss:$8 sps:$4 sm:$0xff]  }
  0x1c   :  { %v212_v54 = vrot.slane %v63_v52, %v4115_v49  ;;  %v3623_v57 = vld [vmem:[%s5243_s20 + $0x1b4] ss:$8 sps:$4 sm:$0xff]   ;;  %v3626_v61 = vld [vmem:[%s5243_s20 + $0x1b0] ss:$8 sps:$4 sm:$0xff]   ;;  %v3627_v62 = vld [vmem:[%s5243_s20 + $0xa4] ss:$8 sps:$4 sm:$0xff]   ;;  %v205_v1 = vcombine.high %v63_v52, %v63_v52 }
  0x1d   :  { %911 = vmatpush1.bf16.msra.mxu0 %v3577_v18  ;;  %v3629_v63 = vld [vmem:[%s5243_s20 + $0x1a4] ss:$8 sps:$4 sm:$0xff]   ;;  %v3631_v2 = vld [vmem:[%s5243_s20 + $0xa0] ss:$8 sps:$4 sm:$0xff]   ;;  %v3633_v4 = vld [vmem:[%s5243_s20 + $0x94] ss:$8 sps:$4 sm:$0xff]  }
  0x1e   :  { %952 = vmatpush1.bf16.msra.mxu1 %v3578_v19  ;;  %912 = vmatprep.subr.bf16.mxu0 %v3579_v20  ;;  %v220_v58 = vcombine.high %v212_v54, %v212_v54  ;;  %v3632_v3 = vld [vmem:[%s5243_s20 + $0x1a0] ss:$8 sps:$4 sm:$0xff]   ;;  %v3635_v5 = vld [vmem:[%s5243_s20 + $0x194] ss:$8 sps:$4 sm:$0xff]   ;;  %v4165_v6 = vrot.slane %v205_v1, %v4115_v49  ;;  %v3637_v7 = vld [vmem:[%s5243_s20 + $0x90] ss:$8 sps:$4 sm:$0xff]   ;;  %v228_v13 = vrot.slane %v212_v54, %v4115_v49 }
  0x1f   :  { %953 = vmatprep.subr.bf16.mxu1 %v3581_v21  ;;  %v3638_v8 = vld [vmem:[%s5243_s20 + $0x190] ss:$8 sps:$4 sm:$0xff]   ;;  %v3639_v9 = vld [vmem:[%s5243_s20 + $0x84] ss:$8 sps:$4 sm:$0xff]   ;;  %v3643_v12 = vld [vmem:[%s5243_s20 + $0x80] ss:$8 sps:$4 sm:$0xff]  }
  0x20   :  { %v242_v60 = vrot.slane %v220_v58, %v4115_v49  ;;  %v3641_v10 = vld [vmem:[%s5243_s20 + $0x184] ss:$8 sps:$4 sm:$0xff]   ;;  %v221_v11 = vcombine.high %v4165_v6, %v4165_v6  ;;  %v3644_v14 = vld [vmem:[%s5243_s20 + $0x180] ss:$8 sps:$4 sm:$0xff]   ;;  %v3648_v15 = vld [vmem:[%s5243_s20 + $0x274] ss:$8 sps:$4 sm:$0xff]   ;;  %v250_v18 = vcombine.high %v228_v13, %v228_v13 }
  0x21   :  { %913 = vmatpush1.bf16.msra.mxu0 %v3583_v22  ;;  %v3651_v16 = vld [vmem:[%s5243_s20 + $0x374] ss:$8 sps:$4 sm:$0xff]   ;;  %v3646_v19 = vld [vmem:[%s5243_s20 + $0x270] ss:$8 sps:$4 sm:$0xff]   ;;  %v3654_v21 = vld [vmem:[%s5243_s20 + $0x264] ss:$8 sps:$4 sm:$0xff]  }
  0x22   :  { %954 = vmatpush1.bf16.msra.mxu1 %v3584_v23  ;;  %914 = vmatprep.subr.bf16.mxu0 %v3585_v24  ;;  %v252_v0 = vcombine.high %v242_v60, %v242_v60  ;;  %v249_v17 = vrot.slane %v221_v11, %v4115_v49  ;;  %v3649_v20 = vld [vmem:[%s5243_s20 + $0x370] ss:$8 sps:$4 sm:$0xff]   ;;  %v3657_v22 = vld [vmem:[%s5243_s20 + $0x364] ss:$8 sps:$4 sm:$0xff]   ;;  %v3652_v24 = vld [vmem:[%s5243_s20 + $0x260] ss:$8 sps:$4 sm:$0xff]  }
  0x23   :  { %955 = vmatprep.subr.bf16.mxu1 %v3587_v25  ;;  %934 = vmatprep.mubr.bf16.mxu0 %v242_v60  ;;  %v3655_v25 = vld [vmem:[%s5243_s20 + $0x360] ss:$8 sps:$4 sm:$0xff]   ;;  %v3670_v36 = vld [vmem:[%s5243_s20 + $0x230] ss:$8 sps:$4 sm:$0xff]   ;;  %v3678_v38 = vld [vmem:[%s5243_s20 + $0x224] ss:$8 sps:$4 sm:$0xff]  }
  0x24   :  { %975 = vmatprep.mubr.bf16.mxu1 %v252_v0  ;;  %v253_v23 = vcombine.high %v249_v17, %v249_v17  ;;  %v3673_v37 = vld [vmem:[%s5243_s20 + $0x330] ss:$8 sps:$4 sm:$0xff]   ;;  %v3684_v43 = vld [vmem:[%s5243_s20 + $0x214] ss:$8 sps:$4 sm:$0xff]   ;;  %v3700_v58 = vld [vmem:[%s5243_s20 + $0x2e0] ss:$8 sps:$4 sm:$0xff]  }
  0x25   :  { %915 = vmatpush1.bf16.msra.mxu0 %v3589_v26  ;;  %v3660_v26 = vld [vmem:[%s5243_s20 + $0x254] ss:$8 sps:$4 sm:$0xff]   ;;  %v3694_v54 = vld [vmem:[%s5243_s20 + $0x2f0] ss:$8 sps:$4 sm:$0xff]   ;;  %v3714_v0 = vld [vmem:[%s5243_s20 + $0x2c4] ss:$8 sps:$4 sm:$0xff]  }
  0x26   :  { %956 = vmatpush1.bf16.msra.mxu1 %v3590_v27  ;;  %916 = vmatprep.subr.bf16.mxu0 %v3591_v28  ;;  %v3663_v27 = vld [vmem:[%s5243_s20 + $0x354] ss:$8 sps:$4 sm:$0xff]   ;;  %v3658_v28 = vld [vmem:[%s5243_s20 + $0x250] ss:$8 sps:$4 sm:$0xff]   ;;  %v3717_v1 = vld [vmem:[%s5243_s20 + $0x3c4] ss:$8 sps:$4 sm:$0xff]  }
  0x27   :  { %957 = vmatprep.subr.bf16.mxu1 %v3593_v29  ;;  %v3661_v29 = vld [vmem:[%s5243_s20 + $0x350] ss:$8 sps:$4 sm:$0xff]   ;;  %v3696_v52 = vld [vmem:[%s5243_s20 + $0x2f4] ss:$8 sps:$4 sm:$0xff]  }
  0x28   :  { %v3708_v60 = vld [vmem:[%s5243_s20 + $0x2d4] ss:$8 sps:$4 sm:$0xff]  }
  0x29   :  { %917 = vmatpush1.bf16.msra.mxu0 %v3595_v30  ;;  %v3666_v30 = vld [vmem:[%s5243_s20 + $0x244] ss:$8 sps:$4 sm:$0xff]  }
  0x2a   :  { %958 = vmatpush1.bf16.msra.mxu1 %v3596_v31  ;;  %918 = vmatprep.subr.bf16.mxu0 %v3597_v32  ;;  %v3669_v31 = vld [vmem:[%s5243_s20 + $0x344] ss:$8 sps:$4 sm:$0xff]   ;;  %v3664_v32 = vld [vmem:[%s5243_s20 + $0x240] ss:$8 sps:$4 sm:$0xff]  }
  0x2b   :  { %959 = vmatprep.subr.bf16.mxu1 %v3599_v33  ;;  %v3667_v33 = vld [vmem:[%s5243_s20 + $0x340] ss:$8 sps:$4 sm:$0xff]  }
  0x2d   :  { %919 = vmatpush2.bf16.msra.mxu0 %v3601_v34  ;;  %v3672_v34 = vld [vmem:[%s5243_s20 + $0x234] ss:$8 sps:$4 sm:$0xff]  }
  0x2e   :  { %960 = vmatpush2.bf16.msra.mxu1 %v3602_v35  ;;  %920 = vmatprep.subr.bf16.mxu0 %v3603_v39  ;;  %v3675_v35 = vld [vmem:[%s5243_s20 + $0x334] ss:$8 sps:$4 sm:$0xff]   ;;  %v3681_v39 = vld [vmem:[%s5243_s20 + $0x324] ss:$8 sps:$4 sm:$0xff]  }
  0x2f   :  { %961 = vmatprep.subr.bf16.mxu1 %v3605_v40  ;;  %v3676_v40 = vld [vmem:[%s5243_s20 + $0x220] ss:$8 sps:$4 sm:$0xff]  }
  0x31   :  { %921 = vmatpush2.bf16.msra.mxu0 %v3607_v41  ;;  %v3679_v41 = vld [vmem:[%s5243_s20 + $0x320] ss:$8 sps:$4 sm:$0xff]  }
  0x32   :  { %962 = vmatpush2.bf16.msra.mxu1 %v3608_v44  ;;  %922 = vmatprep.subr.bf16.mxu0 %v3609_v45  ;;  %v3687_v44 = vld [vmem:[%s5243_s20 + $0x314] ss:$8 sps:$4 sm:$0xff]   ;;  %v3682_v45 = vld [vmem:[%s5243_s20 + $0x210] ss:$8 sps:$4 sm:$0xff]  }
  0x33   :  { %963 = vmatprep.subr.bf16.mxu1 %v3611_v46  ;;  %v3685_v46 = vld [vmem:[%s5243_s20 + $0x310] ss:$8 sps:$4 sm:$0xff]  }
  0x35   :  { %923 = vmatpush2.bf16.msra.mxu0 %v3613_v47  ;;  %v3690_v47 = vld [vmem:[%s5243_s20 + $0x204] ss:$8 sps:$4 sm:$0xff]  }
  0x36   :  { %964 = vmatpush2.bf16.msra.mxu1 %v3614_v48  ;;  %924 = vmatprep.subr.bf16.mxu0 %v3615_v50  ;;  %v3693_v48 = vld [vmem:[%s5243_s20 + $0x304] ss:$8 sps:$4 sm:$0xff]   ;;  %v3688_v50 = vld [vmem:[%s5243_s20 + $0x200] ss:$8 sps:$4 sm:$0xff]  }
  0x37   :  { %965 = vmatprep.subr.bf16.mxu1 %v3617_v51  ;;  %v3691_v51 = vld [vmem:[%s5243_s20 + $0x300] ss:$8 sps:$4 sm:$0xff]  }
  0x39   :  { %925 = vmatpush2.bf16.msra.mxu0 %v3619_v53  ;;  %v3699_v53 = vld [vmem:[%s5243_s20 + $0x3f4] ss:$8 sps:$4 sm:$0xff]  }
  0x3a   :  { %966 = vmatpush2.bf16.msra.mxu1 %v3620_v55  ;;  %926 = vmatprep.subr.bf16.mxu0 %v3621_v56  ;;  %v3697_v55 = vld [vmem:[%s5243_s20 + $0x3f0] ss:$8 sps:$4 sm:$0xff]   ;;  %v3702_v56 = vld [vmem:[%s5243_s20 + $0x2e4] ss:$8 sps:$4 sm:$0xff]  }
  0x3b   :  { %967 = vmatprep.subr.bf16.mxu1 %v3623_v57  ;;  %v3705_v57 = vld [vmem:[%s5243_s20 + $0x3e4] ss:$8 sps:$4 sm:$0xff]  }
  0x3d   :  { %927 = vmatpush2.bf16.msra.mxu0 %v3625_v59  ;;  %v3703_v59 = vld [vmem:[%s5243_s20 + $0x3e0] ss:$8 sps:$4 sm:$0xff]  }
  0x3e   :  { %968 = vmatpush2.bf16.msra.mxu1 %v3626_v61  ;;  %928 = vmatprep.subr.bf16.mxu0 %v3627_v62  ;;  %v3711_v61 = vld [vmem:[%s5243_s20 + $0x3d4] ss:$8 sps:$4 sm:$0xff]   ;;  %v3706_v62 = vld [vmem:[%s5243_s20 + $0x2d0] ss:$8 sps:$4 sm:$0xff]  }
  0x3f   :  { %969 = vmatprep.subr.bf16.mxu1 %v3629_v63  ;;  %v3709_v63 = vld [vmem:[%s5243_s20 + $0x3d0] ss:$8 sps:$4 sm:$0xff]  }
  0x41   :  { %929 = vmatpush2.bf16.msra.mxu0 %v3631_v2  ;;  %v3712_v2 = vld [vmem:[%s5243_s20 + $0x2c0] ss:$8 sps:$4 sm:$0xff]  }
  0x42   :  { %970 = vmatpush2.bf16.msra.mxu1 %v3632_v3  ;;  %930 = vmatprep.subr.bf16.mxu0 %v3633_v4  ;;  %v3715_v3 = vld [vmem:[%s5243_s20 + $0x3c0] ss:$8 sps:$4 sm:$0xff]   ;;  %v3720_v4 = vld [vmem:[%s5243_s20 + $0x2b4] ss:$8 sps:$4 sm:$0xff]  }
  0x43   :  { %971 = vmatprep.subr.bf16.mxu1 %v3635_v5  ;;  %v3723_v5 = vld [vmem:[%s5243_s20 + $0x3b4] ss:$8 sps:$4 sm:$0xff]  }
  0x45   :  { %931 = vmatpush2.bf16.msra.mxu0 %v3637_v7  ;;  %v3718_v7 = vld [vmem:[%s5243_s20 + $0x2b0] ss:$8 sps:$4 sm:$0xff]  }
  0x46   :  { %972 = vmatpush2.bf16.msra.mxu1 %v3638_v8  ;;  %932 = vmatprep.subr.bf16.mxu0 %v3639_v9  ;;  %v3721_v8 = vld [vmem:[%s5243_s20 + $0x3b0] ss:$8 sps:$4 sm:$0xff]   ;;  %v3726_v9 = vld [vmem:[%s5243_s20 + $0x2a4] ss:$8 sps:$4 sm:$0xff]  }
  0x47   :  { %973 = vmatprep.subr.bf16.mxu1 %v3641_v10  ;;  %v3729_v10 = vld [vmem:[%s5243_s20 + $0x3a4] ss:$8 sps:$4 sm:$0xff]  }
  0x49   :  { %933 = vmatpush2.bf16.msra.mxu0 %v3643_v12 }
  0x4a   :  { %974 = vmatpush2.bf16.msra.mxu1 %v3644_v14  ;;  %984 = vmatprep.subr.bf16.mxu0 %v3648_v15 }
  0x4b   :  { %1025 = vmatprep.subr.bf16.mxu1 %v3651_v16 }
  0x4c   :  { %935 = vmatmul.mubr.bf16.vlgmr.msra.gmra.mxu0 %v228_v13 }
  0x4d   :  { %976 = vmatmul.mubr.bf16.vlgmr.msra.gmra.mxu1 %v250_v18  ;;  %985 = vmatpush1.bf16.msra.mxu0 %v3646_v19 }
  0x4e   :  { %1026 = vmatpush1.bf16.msra.mxu1 %v3649_v20  ;;  %986 = vmatprep.subr.bf16.mxu0 %v3654_v21 }
  0x4f   :  { %1027 = vmatprep.subr.bf16.mxu1 %v3657_v22  ;;  %1016 = vmatprep.mubr.bf16.mxu0 %v249_v17 }
  0x50   :  { %1057 = vmatprep.mubr.bf16.mxu1 %v253_v23 }
  0x51   :  { %987 = vmatpush1.bf16.msra.mxu0 %v3652_v24 }
  0x52   :  { %1028 = vmatpush1.bf16.msra.mxu1 %v3655_v25  ;;  %988 = vmatprep.subr.bf16.mxu0 %v3660_v26 }
  0x53   :  { %1029 = vmatprep.subr.bf16.mxu1 %v3663_v27 }
  0x55   :  { %989 = vmatpush1.bf16.msra.mxu0 %v3658_v28 }
  0x56   :  { %1030 = vmatpush1.bf16.msra.mxu1 %v3661_v29  ;;  %990 = vmatprep.subr.bf16.mxu0 %v3666_v30 }
  0x57   :  { %1031 = vmatprep.subr.bf16.mxu1 %v3669_v31 }
  0x59   :  { %991 = vmatpush1.bf16.msra.mxu0 %v3664_v32 }
  0x5a   :  { %1032 = vmatpush1.bf16.msra.mxu1 %v3667_v33  ;;  %992 = vmatprep.subr.bf16.mxu0 %v3672_v34 }
  0x5b   :  { %1033 = vmatprep.subr.bf16.mxu1 %v3675_v35 }
  0x5d   :  { %993 = vmatpush1.bf16.msra.mxu0 %v3670_v36 }
  0x5e   :  { %1034 = vmatpush1.bf16.msra.mxu1 %v3673_v37  ;;  %994 = vmatprep.subr.bf16.mxu0 %v3678_v38 }
  0x5f   :  { %1035 = vmatprep.subr.bf16.mxu1 %v3681_v39 }
  0x61   :  { %995 = vmatpush1.bf16.msra.mxu0 %v3676_v40 }
  0x62   :  { %1036 = vmatpush1.bf16.msra.mxu1 %v3679_v41  ;;  %996 = vmatprep.subr.bf16.mxu0 %v3684_v43 }
  0x63   :  { %1037 = vmatprep.subr.bf16.mxu1 %v3687_v44 }
  0x65   :  { %997 = vmatpush1.bf16.msra.mxu0 %v3682_v45 }
  0x66   :  { %1038 = vmatpush1.bf16.msra.mxu1 %v3685_v46  ;;  %998 = vmatprep.subr.bf16.mxu0 %v3690_v47 }
  0x67   :  { %1039 = vmatprep.subr.bf16.mxu1 %v3693_v48 }
  0x69   :  { %999 = vmatpush1.bf16.msra.mxu0 %v3688_v50 }
  0x6a   :  { %1040 = vmatpush1.bf16.msra.mxu1 %v3691_v51  ;;  %1000 = vmatprep.subr.bf16.mxu0 %v3696_v52 }
  0x6b   :  { %1041 = vmatprep.subr.bf16.mxu1 %v3699_v53 }
  0x6d   :  { %1001 = vmatpush2.bf16.msra.mxu0 %v3694_v54 }
  0x6e   :  { %1042 = vmatpush2.bf16.msra.mxu1 %v3697_v55  ;;  %1002 = vmatprep.subr.bf16.mxu0 %v3702_v56 }
  0x6f   :  { %1043 = vmatprep.subr.bf16.mxu1 %v3705_v57 }
  0x71   :  { %1003 = vmatpush2.bf16.msra.mxu0 %v3700_v58 }
  0x72   :  { %1044 = vmatpush2.bf16.msra.mxu1 %v3703_v59  ;;  %1004 = vmatprep.subr.bf16.mxu0 %v3708_v60 }
  0x73   :  { %1045 = vmatprep.subr.bf16.mxu1 %v3711_v61 }
  0x75   :  { %1005 = vmatpush2.bf16.msra.mxu0 %v3706_v62 }
  0x76   :  { %1046 = vmatpush2.bf16.msra.mxu1 %v3709_v63  ;;  %1006 = vmatprep.subr.bf16.mxu0 %v3714_v0 }
  0x77   :  { %1047 = vmatprep.subr.bf16.mxu1 %v3717_v1 }
  0x79   :  { %1007 = vmatpush2.bf16.msra.mxu0 %v3712_v2 }
  0x7a   :  { %1048 = vmatpush2.bf16.msra.mxu1 %v3715_v3  ;;  %1008 = vmatprep.subr.bf16.mxu0 %v3720_v4 }
  0x7b   :  { %1049 = vmatprep.subr.bf16.mxu1 %v3723_v5 }
  0x7c   :  { %25 = vsyncpa [#allocation3], 0  ;;  %v3724_v11 = vld [vmem:[%s5243_s20 + $0x2a0] ss:$8 sps:$4 sm:$0xff]   ;;  %v3732_v13 = vld [vmem:[%s5243_s20 + $0x294] ss:$8 sps:$4 sm:$0xff]   ;;  %v235_v19 = vrot.slane %v4165_v6, %v4115_v49 }
  0x7d   :  { %1009 = vmatpush2.bf16.msra.mxu0 %v3718_v7  ;;  %v3727_v12 = vld [vmem:[%s5243_s20 + $0x3a0] ss:$8 sps:$4 sm:$0xff]   ;;  %v3735_v14 = vld [vmem:[%s5243_s20 + $0x394] ss:$8 sps:$4 sm:$0xff]   ;;  %v3730_v15 = vld [vmem:[%s5243_s20 + $0x290] ss:$8 sps:$4 sm:$0xff]  }
  0x7e   :  { %1050 = vmatpush2.bf16.msra.mxu1 %v3721_v8  ;;  %1010 = vmatprep.subr.bf16.mxu0 %v3726_v9  ;;  %v3733_v16 = vld [vmem:[%s5243_s20 + $0x390] ss:$8 sps:$4 sm:$0xff]   ;;  %v3738_v17 = vld [vmem:[%s5243_s20 + $0x284] ss:$8 sps:$4 sm:$0xff]   ;;  %v3736_v20 = vld [vmem:[%s5243_s20 + $0x280] ss:$8 sps:$4 sm:$0xff]   ;;  %v251_v22 = vcombine.high %v235_v19, %v235_v19 }
  0x7f   :  { %1051 = vmatprep.subr.bf16.mxu1 %v3729_v10  ;;  %v3741_v18 = vld [vmem:[%s5243_s20 + $0x384] ss:$8 sps:$4 sm:$0xff]   ;;  %v3739_v21 = vld [vmem:[%s5243_s20 + $0x380] ss:$8 sps:$4 sm:$0xff]   ;;  %v3742_v6 = vld [vmem:[%s5221_s4 + $0x78] sm:$0xff]   ;;  %v3873_v39 = vmov 0.0  }
  0x80   :  { %v3743_v23 = vld [vmem:[%s5221_s4 + $0x38] sm:$0xff]   ;;  %v3744_v24 = vld [vmem:[%s5221_s4 + $0x70] sm:$0xff]   ;;  %v3746_v26 = vld [vmem:[%s5221_s4 + $0x68] sm:$0xff]   ;;  %v4453_v54 = vsub.s32 0, %v4097_v42  ;;  %s5245_s23 = sld [smem:[#allocation8_spill]]  ;;  %v4459_v56 = vsub.s32 1, %v4097_v42 }
  0x81   :  { %1011 = vmatpush2.bf16.msra.mxu0 %v3724_v11  ;;  %v3745_v25 = vld [vmem:[%s5221_s4 + $0x30] sm:$0xff]   ;;  %v3747_v27 = vld [vmem:[%s5221_s4 + $0x28] sm:$0xff]   ;;  %v3748_v28 = vld [vmem:[%s5221_s4 + $0x60] sm:$0xff]   ;;  %vm3874_vm0 = vmmov 0   ;;  %vm1399_vm1 = vcmask 523264   ;;  %s3877_s28 = smov 32  }
  0x82   :  { %1052 = vmatpush2.bf16.msra.mxu1 %v3727_v12  ;;  %1012 = vmatprep.subr.bf16.mxu0 %v3732_v13  ;;  %v3749_v29 = vld [vmem:[%s5221_s4 + $0x20] sm:$0xff]   ;;  %v3750_v30 = vld [vmem:[%s5221_s4 + $0x58] sm:$0xff]   ;;  %v3752_v32 = vld [vmem:[%s5221_s4 + $0x50] sm:$0xff]   ;;  %vm1485_vm2 = vcmask 261120   ;;  %vm3101_vm3 = vcmask 254976   ;;  %vm3070_vm12 = vcmask 1041408  }
  0x83   :  { %1053 = vmatprep.subr.bf16.mxu1 %v3735_v14  ;;  %v3751_v31 = vld [vmem:[%s5221_s4 + $0x18] sm:$0xff]   ;;  %v3753_v33 = vld [vmem:[%s5221_s4 + $0x10] sm:$0xff]   ;;  %v3754_v34 = vld [vmem:[%s5221_s4 + $0x48] sm:$0xff]  }
  0x84   :  { %v3755_v35 = vld [vmem:[%s5221_s4 + $0x8] sm:$0xff]   ;;  %v3756_v36 = vld [vmem:[%s5221_s4 + $0x40] sm:$0xff]   ;;  %v3758_v38 = vld [vmem:[%s5223_s6 + $0x38] sm:$0xff]  }
  0x85   :  { %1013 = vmatpush2.bf16.msra.mxu0 %v3730_v15  ;;  %v3757_v37 = vld [vmem:[%s5221_s4] sm:$0xff]   ;;  %v3759_v40 = vld [vmem:[%s5223_s6 + $0x30] sm:$0xff]   ;;  %v3760_v41 = vld [vmem:[%s5223_s6 + $0x28] sm:$0xff]   ;;  %s5246_s4 = sld [smem:[#allocation6_spill]] }
  0x86   :  { %1054 = vmatpush2.bf16.msra.mxu1 %v3733_v16  ;;  %1014 = vmatprep.subr.bf16.mxu0 %v3738_v17  ;;  %v3761_v43 = vld [vmem:[%s5223_s6 + $0x20] sm:$0xff]   ;;  %v3762_v44 = vld [vmem:[%s5223_s6 + $0x18] sm:$0xff]   ;;  %v3763_v16 = vld [vmem:[%s5223_s6 + $0x10] sm:$0xff]  }
  0x87   :  { %1055 = vmatprep.subr.bf16.mxu1 %v3741_v18  ;;  %v192_v55 = vld [vmem:[%s5245_s23] sm:$0x3]  ;;  %v3764_v17 = vld [vmem:[%s5223_s6 + $0x8] sm:$0xff]  }
  0x88   :  { %v197_v57 = vrot.slane %v192_v55, %v4453_v54  ;;  %v201_v58 = vrot.slane %v192_v55, %v4459_v56  ;;  %v3765_v18 = vld [vmem:[%s5223_s6] sm:$0xff]  }
  0x89   :  { %1015 = vmatpush2.bf16.msra.mxu0 %v3736_v20  ;;  %v3255_v20 = vld [vmem:[%s5222_s5] ss:$0 sm:$0xff] }
  0x8a   :  { %1056 = vmatpush2.bf16.msra.mxu1 %v3739_v21  ;;  %3445 = vmatprep.subr.bf16.mxu0 %v3742_v6 }
  0x8b   :  { %3489 = vmatprep.subr.bf16.mxu1 %v3873_v39 }
  0x8c   :  { %1017 = vmatmul.mubr.bf16.vlgmr.msra.gmra.mxu0 %v235_v19 }
  0x8d   :  { %1058 = vmatmul.mubr.bf16.vlgmr.msra.gmra.mxu1 %v251_v22  ;;  %3446 = vmatpush3.bf16.msra.mxu0 %v3743_v23 }
  0x8e   :  { %3447 = vmatprep.subr.bf16.mxu0 %v3744_v24  ;;  %3490 = vmatpush3.bf16.msra.mxu1 %v3758_v38 }
  0x8f   :  { %3491 = vmatprep.subr.bf16.mxu1 %v3873_v39  ;;  %3505 = vmatprep.mubr.msk.bf16.mxu1 %vm3874_vm0, %v3873_v39 }
  0x91   :  { %3448 = vmatpush3.bf16.msra.mxu0 %v3745_v25 }
  0x92   :  { %3449 = vmatprep.subr.bf16.mxu0 %v3746_v26  ;;  %3492 = vmatpush3.bf16.msra.mxu1 %v3759_v40  ;;  %v3766_v26 = vld [vmem:[%s5225_s8 + $0x18] sm:$0xff]   ;;  %v3770_v40 = vld [vmem:[%s5227_s10 + $0x8] sm:$0xff]  }
  0x93   :  { %3493 = vmatprep.subr.bf16.mxu1 %v3873_v39 }
  0x95   :  { %3450 = vmatpush3.bf16.msra.mxu0 %v3747_v27 }
  0x96   :  { %3451 = vmatprep.subr.bf16.mxu0 %v3748_v28  ;;  %3494 = vmatpush3.bf16.msra.mxu1 %v3760_v41  ;;  %v3767_v28 = vld [vmem:[%s5225_s8 + $0x10] sm:$0xff]   ;;  %v3281_v41 = vld [vmem:[%s5226_s9] ss:$0 sm:$0xff]  ;;  %s3876_s9 = smov 96  }
  0x97   :  { %3495 = vmatprep.subr.bf16.mxu1 %v3873_v39 }
  0x99   :  { %3452 = vmatpush3.bf16.msra.mxu0 %v3749_v29  ;;  %v3768_v29 = vld [vmem:[%s5225_s8 + $0x8] sm:$0xff]  }
  0x9a   :  { %3453 = vmatprep.subr.bf16.mxu0 %v3750_v30  ;;  %3496 = vmatpush3.bf16.msra.mxu1 %v3761_v43  ;;  %v3769_v30 = vld [vmem:[%s5225_s8] sm:$0xff]  }
  0x9b   :  { %3497 = vmatprep.subr.bf16.mxu1 %v3873_v39 }
  0x9d   :  { %3454 = vmatpush3.bf16.msra.mxu0 %v3751_v31  ;;  %v3272_v31 = vld [vmem:[%s5224_s7] ss:$0 sm:$0xff] }
  0x9e   :  { %3455 = vmatprep.subr.bf16.mxu0 %v3752_v32  ;;  %3498 = vmatpush3.bf16.msra.mxu1 %v3762_v44 }
  0x9f   :  { %3499 = vmatprep.subr.bf16.mxu1 %v3873_v39 }
  0xa1   :  { %3456 = vmatpush3.bf16.msra.mxu0 %v3753_v33 }
  0xa2   :  { %3457 = vmatprep.subr.bf16.mxu0 %v3754_v34  ;;  %3500 = vmatpush3.bf16.msra.mxu1 %v3763_v16  ;;  %v3778_v16 = vld [vmem:[%s5231_s14 + $0x74] ss:$8 sps:$4 sm:$0xff]  }
  0xa3   :  { %3501 = vmatprep.subr.bf16.mxu1 %v3873_v39 }
  0xa5   :  { %3458 = vmatpush3.bf16.msra.mxu0 %v3755_v35 }
  0xa6   :  { %3459 = vmatprep.subr.bf16.mxu0 %v3756_v36  ;;  %3502 = vmatpush3.bf16.msra.mxu1 %v3764_v17  ;;  %v3779_v17 = vld [vmem:[%s5231_s14 + $0x60] ss:$8 sps:$4 sm:$0xff]  }
  0xa7   :  { %3503 = vmatprep.subr.bf16.mxu1 %v3873_v39 }
  0xa9   :  { %3460 = vmatpush3.bf16.msra.mxu0 %v3757_v37 }
  0xaa   :  { %3504 = vmatpush3.bf16.msra.mxu1 %v3765_v18  ;;  %1723 = vmatprep.subr.bf16.mxu0 %v3778_v16  ;;  %v3784_v18 = vld [vmem:[%s5231_s14 + $0x54] ss:$8 sps:$4 sm:$0xff]  }
  0xab   :  { %3509 = vmatprep.subr.bf16.mxu1 %v3873_v39 }
 0x10c   :  { %v936_v45 = vpop.f32.mrf.mxu0 }
 0x10d   :  { %v977_v46 = vpop.f32.mrf.mxu1  ;;  %v937_v59 = vadd.f32 %v936_v45, %v197_v57 }
 0x10e   :  { %v938_v47 = vpop.f32.mrf.mxu0 }
 0x10f   :  { %v979_v48 = vpop.f32.mrf.mxu1  ;;  %v939_v60 = vadd.f32 %v938_v47, %v201_v58  ;;  %v978_v61 = vadd.f32 %v977_v46, %v937_v59 }
 0x110   :  { %v940_v50 = vpop.f32.mrf.mxu0 }
 0x111   :  { %v981_v51 = vpop.f32.mrf.mxu1  ;;  %v980_v0 = vadd.f32 %v979_v48, %v939_v60 }
 0x112   :  { %v941_v52 = vpop.f32.mrf.mxu0  ;;  %v3875_v51 = vmov 1983009808  }
 0x113   :  { %v982_v53 = vpop.f32.mrf.mxu1  ;;  %v1450_v52 = vunpack.c.l.s4 %v3875_v51 }
 0x114   :  { %v3771_v53 = vld [vmem:[%s5227_s10] sm:$0xff]  }
 0x115   :  { %v1451_v55 = vunpack.c.0.s8 %v1450_v52 }
 0x117   :  { %v4516_v57 = vsub.s32 %v1451_v55, %v4097_v42  ;;  %v1812_v55 = vld [vmem:[%s5233_s16 + $0x160] sm:$0xff] }
 0x14c   :  { %v1018_v62 = vpop.f32.mrf.mxu0 }
 0x14d   :  { %v1059_v63 = vpop.f32.mrf.mxu1  ;;  %v1019_v1 = vadd.f32 %v1018_v62, %v978_v61  ;;  %v1446_v61 = vld [vmem:[%s5246_s4] sm:$0x1] }
 0x14e   :  { %v1020_v2 = vpop.f32.mrf.mxu0  ;;  %v1447_v62 = vunpack.c.l.bf16 %v1446_v61  ;;  %v1804_v61 = vld [vmem:[%s5233_s16 + $0x120] sm:$0xff] }
 0x14f   :  { %v1061_v3 = vpop.f32.mrf.mxu1  ;;  %v1060_v4 = vadd.f32 %v1059_v63, %v1019_v1  ;;  %v1021_v5 = vadd.f32 %v1020_v2, %v980_v0 }
 0x150   :  { %v1022_v7 = vpop.f32.mrf.mxu0 }
 0x151   :  { %v1063_v8 = vpop.f32.mrf.mxu1  ;;  %v1062_v9 = vadd.f32 %v1061_v3, %v1021_v5  ;;  %v1066_v10 = vmax.f32 %v1060_v4, 0.0  ;;  %v3772_v4 = vld [vmem:[%s5229_s12 + $0x18] sm:$0xff]  }
 0x152   :  { %v1023_v11 = vpop.f32.mrf.mxu0 }
 0x153   :  { %v1064_v12 = vpop.f32.mrf.mxu1  ;;  %v1067_v13 = vmax.f32 %v1062_v9, 0.0  ;;  %v1068_v15 = vpack.c.bf16 %v1066_v10, %v1066_v10  ;;  %v3773_v10 = vld [vmem:[%s5229_s12 + $0x10] sm:$0xff]   ;;  %v3774_v11 = vld [vmem:[%s5229_s12 + $0x8] sm:$0xff]  }
 0x154   :  { %v3775_v12 = vld [vmem:[%s5229_s12] sm:$0xff]  }
 0x155   :  { %v1069_v14 = vpack.c.bf16 %v1067_v13, %v1067_v13 }
 0x157   :  { %1237 = vmatprep.mubr.bf16.mxu0 %v1069_v14 }
 0x158   :  { %1238 = vmatmul.mubr.bf16.vlgmr.msra.gmra.mxu0 %v1068_v15  ;;  %v3776_v15 = vld [vmem:[%s5231_s14 + $0x70] ss:$8 sps:$4 sm:$0xff]  }
 0x159   :  { %1724 = vmatpush1.bf16.msra.mxu0 %v3776_v15 }
 0x218   :  { %v3461_v19 = vpop.f32.mrf.mxu0 }
 0x21a   :  { %v3462_v21 = vpop.f32.mrf.mxu0 }
 0x21b   :  { %v3463_v22 = vadd.f32 %v3462_v21, %v3461_v19  ;;  %v3782_v19 = vld [vmem:[%s5231_s14 + $0x50] ss:$8 sps:$4 sm:$0xff]   ;;  %v3785_v21 = vld [vmem:[%s5231_s14 + $0x40] ss:$8 sps:$4 sm:$0xff]  }
 0x21c   :  { %v3464_v6 = vpop.f32.mrf.mxu0 }
 0x21d   :  { %v1240_v23 = vadd.f32 %v3463_v22, %v3255_v20  ;;  %v3787_v20 = vld [vmem:[%s5231_s14 + $0x44] ss:$8 sps:$4 sm:$0xff]   ;;  %v3790_v22 = vld [vmem:[%s5231_s14 + $0x34] ss:$8 sps:$4 sm:$0xff]   ;;  %v3788_v6 = vld [vmem:[%s5231_s14 + $0x30] ss:$8 sps:$4 sm:$0xff]  }
 0x21e   :  { %v3465_v24 = vpop.f32.mrf.mxu0 }
 0x21f   :  { %v1245_v25 = vmax.f32 %v1240_v23, 0.0  ;;  %v3793_v23 = vld [vmem:[%s5231_s14 + $0x24] ss:$8 sps:$4 sm:$0xff]   ;;  %v3791_v24 = vld [vmem:[%s5231_s14 + $0x20] ss:$8 sps:$4 sm:$0xff]  }
 0x221   :  { %v1246_v27 = vpack.c.bf16 %v1245_v25, %v1245_v25  ;;  %v3796_v25 = vld [vmem:[%s5231_s14 + $0x14] ss:$8 sps:$4 sm:$0xff]  }
 0x223   :  { %3506 = vmatmul.mubr.bf16.vlgmr.msra.gmra.mxu1 %v1246_v27  ;;  %v3287_v27 = vld [vmem:[%s5228_s11] ss:$0 sm:$0xff] }
 0x224   :  { %3510 = vmatpush3.bf16.msra.mxu1 %v3766_v26  ;;  %3517 = vmatprep.mubr.msk.bf16.mxu1 %vm3874_vm0, %v3873_v39  ;;  %v3794_v26 = vld [vmem:[%s5231_s14 + $0x10] ss:$8 sps:$4 sm:$0xff]  }
 0x225   :  { %3511 = vmatprep.subr.bf16.mxu1 %v3873_v39 }
 0x228   :  { %3512 = vmatpush3.bf16.msra.mxu1 %v3767_v28 }
 0x229   :  { %3513 = vmatprep.subr.bf16.mxu1 %v3873_v39 }
 0x22c   :  { %3514 = vmatpush3.bf16.msra.mxu1 %v3768_v29 }
 0x22d   :  { %3515 = vmatprep.subr.bf16.mxu1 %v3873_v39 }
 0x230   :  { %3516 = vmatpush3.bf16.msra.mxu1 %v3769_v30 }
 0x231   :  { %3521 = vmatprep.subr.bf16.mxu1 %v3873_v39 }
 0x2e3   :  { %v1352_v32 = vpop.f32.mrf.mxu1 }
 0x2e4   :  { %v1353_v33 = vadd.f32 %v3272_v31, %v1352_v32 }
 0x2e5   :  { %v3507_v34 = vpop.f32.mrf.mxu1 }
 0x2e6   :  { %v1358_v35 = vmax.f32 %v1353_v33, 0.0 }
 0x2e7   :  { %v1355_v36 = vpop.f32.mrf.mxu1 }
 0x2e8   :  { %v1359_v37 = vpack.c.bf16 %v1358_v35, %v1358_v35  ;;  %v3799_v35 = vld [vmem:[%s5231_s14 + $0x4] ss:$8 sps:$4 sm:$0xff]   ;;  %v3797_v36 = vld [vmem:[%s5231_s14] ss:$8 sps:$4 sm:$0xff]  }
 0x2e9   :  { %v3508_v38 = vpop.f32.mrf.mxu1 }
 0x2ea   :  { %3518 = vmatmul.mubr.msk.bf16.vlgmr.msra.gmra.mxu1 %vm1399_vm1, %v1359_v37  ;;  %v3878_v37 = vmov 0   ;;  %v1824_v38 = vld [vmem:[%s5233_s16 + $0x1c0] sm:$0xff] }
 0x2eb   :  { %3525 = vmatprep.mubr.msk.bf16.mxu1 %vm3874_vm0, %v3873_v39  ;;  %3522 = vmatpush3.bf16.msra.mxu1 %v3770_v40  ;;  %v1828_v40 = vld [vmem:[%s5233_s16 + $0x1e0] sm:$0xff] }
 0x2ec   :  { %3523 = vmatprep.subr.bf16.mxu1 %v3873_v39  ;;  %1755 = vmatprep.mubr.bf16.mxu0 %v3878_v37 }
 0x2ef   :  { %3524 = vmatpush3.bf16.msra.mxu1 %v3771_v53  ;;  %v1808_v53 = vld [vmem:[%s5233_s16 + $0x140] sm:$0xff] }
 0x2f0   :  { %3529 = vmatprep.subr.bf16.mxu1 %v3873_v39 }
 0x3aa   :  { %v1437_v43 = vpop.f32.mrf.mxu1 }
 0x3ab   :  { %v1438_v44 = vadd.f32 %v3281_v41, %v1437_v43  ;;  %v4600_v41 = vld [vmem:[%s5233_s16 + $0x1c8] sm:$0xff]  ;;  %v3369_v43 = vcombine.low %v1824_v38, %v1828_v40 }
 0x3ac   :  { %v3519_v45 = vpop.f32.mrf.mxu1 }
 0x3ad   :  { %v1443_v46 = vmul.f32 0.5, %v1438_v44  ;;  %v3089_v60 = vmul.f32 %v1438_v44, %v1438_v44  ;;  %v3088_v2 = vadd.f32 1.0, %v1438_v44  ;;  %v4605_v45 = vld [vmem:[%s5233_s16 + $0x1e8] sm:$0xff] }
 0x3ae   :  { %v1440_v47 = vpop.f32.mrf.mxu1 }
 0x3af   :  { %v1444_v48 = vmul.f32 1.442695, %v1443_v46  ;;  %v1816_v46 = vld [vmem:[%s5233_s16 + $0x180] sm:$0xff] }
 0x3b0   :  { %v3520_v50 = vpop.f32.mrf.mxu1  ;;  %v1820_v47 = vld [vmem:[%s5233_s16 + $0x1a0] sm:$0xff] }
 0x3b1   :  { %3800 = vpow2.f32 %v1444_v48  ;;  %v3371_v48 = vcombine.low %v4600_v41, %v4605_v45  ;;  %v3372_v50 = vcombine.high %v4600_v41, %v4605_v45  ;;  %v3362_v51 = vcombine.high %v1816_v46, %v1820_v47  ;;  %v1793_v41 = vld [vmem:[%s5233_s16 + $0xc8] sm:$0xff] }
 0x3b2   :  { %v3361_v52 = vcombine.low %v1816_v46, %v1820_v47  ;;  %v1817_v47 = vld [vmem:[%s5233_s16 + $0x188] sm:$0xff] }
 0x3b3   :  { %v1797_v45 = vld [vmem:[%s5233_s16 + $0xe8] sm:$0xff] }
 0x3be   :  { %v3801_v58 = vpop.eup %3800 }
 0x3bf   :  { %v1455_v59 = vrot.slane %v3801_v58, %v4516_v57  ;;  %v3095_v8 = vmul.f32 %v3801_v58, %v3801_v58  ;;  %v3354_v58 = vcombine.high %v1808_v53, %v1812_v55 }
 0x3c1   :  { %1456 = vrot.lane.b32.xlu0 %v1455_v59, %s3876_s9  ;;  %v3353_v59 = vcombine.low %v1808_v53, %v1812_v55 }
 0x3c5   :  { %3091 = vrot.lane.b32.xlu0 %v3089_v60, %s3877_s28  ;;  %v1800_v60 = vld [vmem:[%s5233_s16 + $0x100] sm:$0xff] }
 0x433   :  { %v1457_v63 = vpop.permute.xlu0 %1456 }
 0x434   :  { %v1459_v0 = vmul.f32 %v1457_v63, %v1447_v62  ;;  %v3346_v62 = vcombine.high %v1800_v60, %v1804_v61  ;;  %v3345_v63 = vcombine.low %v1800_v60, %v1804_v61  ;;  %v1813_v60 = vld [vmem:[%s5233_s16 + $0x168] sm:$0xff] }
 0x436   :  { %v1460_v1 = vadd.f32 %v1459_v0, %v1438_v44  ;;  %v3370_v44 = vcombine.high %v1824_v38, %v1828_v40  ;;  %v1792_v0 = vld [vmem:[%s5233_s16 + $0xc0] sm:$0xff] }
 0x437   :  { %v3092_v3 = vpop.permute.xlu0 %3091  ;;  %v3291_v40 = vld [vmem:[%s5230_s13] ss:$0 sm:$0xff] }
 0x438   :  { %v1461_v5 = vpack.c.bf16 %v1460_v1, %v1460_v1  ;;  %v3094_v7 = vsub.f32 %v3088_v2, %v3092_v3  ;;  %v1796_v1 = vld [vmem:[%s5233_s16 + $0xe0] sm:$0xff] }
 0x439   :  { %v3338_v2 = vcombine.high %v1792_v0, %v1796_v1  ;;  %v3337_v3 = vcombine.low %v1792_v0, %v1796_v1  ;;  %v1805_v0 = vld [vmem:[%s5233_s16 + $0x128] sm:$0xff] }
 0x43a   :  { %3526 = vmatmul.mubr.msk.bf16.vlgmr.msra.gmra.mxu1 %vm1485_vm2, %v1461_v5  ;;  %v3096_v9 = vsub.f32 %v3094_v7, %v3095_v8  ;;  %v1788_v5 = vld [vmem:[%s5233_s16 + $0xa0] sm:$0xff] }
 0x43b   :  { %3530 = vmatpush3.bf16.msra.mxu1 %v3772_v4  ;;  %3537 = vmatprep.mubr.msk.bf16.mxu1 %vm3874_vm0, %v3873_v39  ;;  %v1784_v4 = vld [vmem:[%s5233_s16 + $0x80] sm:$0xff] }
 0x43c   :  { %3098 = vrot.lane.b32.xlu1 %v3096_v9, %s3876_s9  ;;  %3531 = vmatprep.subr.bf16.mxu1 %v3873_v39  ;;  %v3330_v7 = vcombine.high %v1784_v4, %v1788_v5  ;;  %v3329_v8 = vcombine.low %v1784_v4, %v1788_v5  ;;  %v1776_v9 = vld [vmem:[%s5233_s16 + $0x40] sm:$0xff]  ;;  %v1785_v4 = vld [vmem:[%s5233_s16 + $0x88] sm:$0xff] }
 0x43d   :  { %v1789_v5 = vld [vmem:[%s5233_s16 + $0xa8] sm:$0xff] }
 0x43f   :  { %3532 = vmatpush3.bf16.msra.mxu1 %v3773_v10  ;;  %v1780_v10 = vld [vmem:[%s5233_s16 + $0x60] sm:$0xff] }
 0x440   :  { %3533 = vmatprep.subr.bf16.mxu1 %v3873_v39 }
 0x443   :  { %3534 = vmatpush3.bf16.msra.mxu1 %v3774_v11  ;;  %v3322_v11 = vcombine.high %v1776_v9, %v1780_v10 }
 0x444   :  { %3535 = vmatprep.subr.bf16.mxu1 %v3873_v39  ;;  %v3781_v39 = vld [vmem:[%s5231_s14 + $0x64] ss:$8 sps:$4 sm:$0xff]  }
 0x445   :  { %1725 = vmatprep.subr.bf16.mxu0 %v3781_v39  ;;  %v1888_v39 = vld [vmem:[%s5233_s16 + $0x3c0] sm:$0xff] }
 0x446   :  { %1726 = vmatpush1.bf16.msra.mxu0 %v3779_v17  ;;  %v1892_v17 = vld [vmem:[%s5233_s16 + $0x3e0] sm:$0xff] }
 0x447   :  { %3536 = vmatpush3.bf16.msra.mxu1 %v3775_v12  ;;  %1727 = vmatprep.subr.bf16.mxu0 %v3784_v18  ;;  %v3321_v12 = vcombine.low %v1776_v9, %v1780_v10  ;;  %v3434_v18 = vcombine.high %v1888_v39, %v1892_v17  ;;  %v1777_v9 = vld [vmem:[%s5233_s16 + $0x48] sm:$0xff] }
 0x448   :  { %2578 = vmatprep.subr.bf16.mxu1 %v3370_v44  ;;  %v1781_v10 = vld [vmem:[%s5233_s16 + $0x68] sm:$0xff] }
 0x44a   :  { %1728 = vmatpush1.bf16.msra.mxu0 %v3782_v19  ;;  %v3433_v19 = vcombine.low %v1888_v39, %v1892_v17  ;;  %v1889_v39 = vld [vmem:[%s5233_s16 + $0x3c8] sm:$0xff] }
 0x44b   :  { %1729 = vmatprep.subr.bf16.mxu0 %v3787_v20  ;;  %v1880_v20 = vld [vmem:[%s5233_s16 + $0x380] sm:$0xff]  ;;  %v1893_v17 = vld [vmem:[%s5233_s16 + $0x3e8] sm:$0xff] }
 0x44e   :  { %1730 = vmatpush1.bf16.msra.mxu0 %v3785_v21  ;;  %v1884_v21 = vld [vmem:[%s5233_s16 + $0x3a0] sm:$0xff] }
 0x44f   :  { %1731 = vmatprep.subr.bf16.mxu0 %v3790_v22  ;;  %v3426_v22 = vcombine.high %v1880_v20, %v1884_v21 }
 0x452   :  { %1732 = vmatpush1.bf16.msra.mxu0 %v3788_v6  ;;  %v3425_v6 = vcombine.low %v1880_v20, %v1884_v21  ;;  %v1881_v20 = vld [vmem:[%s5233_s16 + $0x388] sm:$0xff] }
 0x453   :  { %1733 = vmatprep.subr.bf16.mxu0 %v3793_v23  ;;  %v1872_v23 = vld [vmem:[%s5233_s16 + $0x340] sm:$0xff]  ;;  %v1885_v21 = vld [vmem:[%s5233_s16 + $0x3a8] sm:$0xff] }
 0x456   :  { %1734 = vmatpush1.bf16.msra.mxu0 %v3791_v24  ;;  %v1876_v24 = vld [vmem:[%s5233_s16 + $0x360] sm:$0xff] }
 0x457   :  { %1735 = vmatprep.subr.bf16.mxu0 %v3796_v25  ;;  %v3418_v25 = vcombine.high %v1872_v23, %v1876_v24 }
 0x45a   :  { %1736 = vmatpush1.bf16.msra.mxu0 %v3794_v26  ;;  %v3417_v26 = vcombine.low %v1872_v23, %v1876_v24  ;;  %v1873_v23 = vld [vmem:[%s5233_s16 + $0x348] sm:$0xff] }
 0x45b   :  { %1737 = vmatprep.subr.bf16.mxu0 %v3799_v35  ;;  %v1848_v35 = vld [vmem:[%s5233_s16 + $0x280] sm:$0xff]  ;;  %v1877_v24 = vld [vmem:[%s5233_s16 + $0x368] sm:$0xff] }
 0x45e   :  { %1738 = vmatpush1.bf16.msra.mxu0 %v3797_v36  ;;  %v1852_v36 = vld [vmem:[%s5233_s16 + $0x2a0] sm:$0xff] }
 0x45f   :  { %2619 = vmatprep.subr.bf16.mxu0 %v3372_v50  ;;  %v3394_v37 = vcombine.high %v1848_v35, %v1852_v36  ;;  %v3393_v38 = vcombine.low %v1848_v35, %v1852_v36  ;;  %v1821_v50 = vld [vmem:[%s5233_s16 + $0x1a8] sm:$0xff] }
 0x460   :  { %v3364_v55 = vcombine.high %v1817_v47, %v1821_v50  ;;  %v3363_v61 = vcombine.low %v1817_v47, %v1821_v50  ;;  %v1849_v35 = vld [vmem:[%s5233_s16 + $0x288] sm:$0xff] }
 0x461   :  { %v1853_v36 = vld [vmem:[%s5233_s16 + $0x2a8] sm:$0xff] }
 0x462   :  { %v1845_v50 = vld [vmem:[%s5233_s16 + $0x268] sm:$0xff] }
 0x4ae   :  { %v3099_v13 = vpop.permute.xlu1 %3098 }
 0x4af   :  { %v3102_v14 = vsel %vm3101_vm3, %v3099_v13, 0.0  ;;  %v1768_v13 = vld [vmem:[%s5233_s16] sm:$0xff] }
 0x4b0   :  { %3103 = vadd.xlane.f32.xlu1 %v3102_v14  ;;  %v1772_v14 = vld [vmem:[%s5233_s16 + $0x20] sm:$0xff] }
 0x4b1   :  { %v3314_v15 = vcombine.high %v1768_v13, %v1772_v14  ;;  %v3313_v16 = vcombine.low %v1768_v13, %v1772_v14  ;;  %v1769_v13 = vld [vmem:[%s5233_s16 + $0x8] sm:$0xff] }
 0x4b2   :  { %v1773_v14 = vld [vmem:[%s5233_s16 + $0x28] sm:$0xff] }
 0x4fa   :  { %v1523_v28 = vpop.f32.mrf.mxu1 }
 0x4fb   :  { %v1524_v29 = vadd.f32 %v3287_v27, %v1523_v28  ;;  %v1864_v27 = vld [vmem:[%s5233_s16 + $0x300] sm:$0xff] }
 0x4fc   :  { %v3527_v30 = vpop.f32.mrf.mxu1  ;;  %v1868_v28 = vld [vmem:[%s5233_s16 + $0x320] sm:$0xff] }
 0x4fd   :  { %v1529_v31 = vmax.f32 %v1524_v29, 0.0  ;;  %v3410_v29 = vcombine.high %v1864_v27, %v1868_v28  ;;  %v3409_v30 = vcombine.low %v1864_v27, %v1868_v28  ;;  %v1865_v27 = vld [vmem:[%s5233_s16 + $0x308] sm:$0xff] }
 0x4fe   :  { %v1526_v32 = vpop.f32.mrf.mxu1  ;;  %v1869_v28 = vld [vmem:[%s5233_s16 + $0x328] sm:$0xff] }
 0x4ff   :  { %v1530_v33 = vpack.c.bf16 %v1529_v31, %v1529_v31  ;;  %v1856_v31 = vld [vmem:[%s5233_s16 + $0x2c0] sm:$0xff] }
 0x500   :  { %v3528_v34 = vpop.f32.mrf.mxu1  ;;  %v1860_v32 = vld [vmem:[%s5233_s16 + $0x2e0] sm:$0xff] }
 0x501   :  { %3538 = vmatmul.mubr.msk.bf16.vlgmr.msra.gmra.mxu1 %vm1399_vm1, %v1530_v33  ;;  %v3402_v33 = vcombine.high %v1856_v31, %v1860_v32  ;;  %v3401_v34 = vcombine.low %v1856_v31, %v1860_v32  ;;  %v1857_v31 = vld [vmem:[%s5233_s16 + $0x2c8] sm:$0xff] }
 0x502   :  { %2579 = vmatpush1.bf16.msra.mxu1 %v3369_v43  ;;  %v1861_v32 = vld [vmem:[%s5233_s16 + $0x2e8] sm:$0xff] }
 0x503   :  { %2580 = vmatprep.subr.bf16.mxu1 %v3362_v51 }
 0x506   :  { %2581 = vmatpush1.bf16.msra.mxu1 %v3361_v52 }
 0x507   :  { %2582 = vmatprep.subr.bf16.mxu1 %v3354_v58 }
 0x50a   :  { %2583 = vmatpush1.bf16.msra.mxu1 %v3353_v59  ;;  %v1809_v59 = vld [vmem:[%s5233_s16 + $0x148] sm:$0xff] }
 0x50b   :  { %2584 = vmatprep.subr.bf16.mxu1 %v3346_v62  ;;  %v3356_v62 = vcombine.high %v1809_v59, %v1813_v60  ;;  %v3355_v1 = vcombine.low %v1809_v59, %v1813_v60  ;;  %v1833_v59 = vld [vmem:[%s5233_s16 + $0x208] sm:$0xff] }
 0x50e   :  { %2585 = vmatpush1.bf16.msra.mxu1 %v3345_v63  ;;  %v1801_v63 = vld [vmem:[%s5233_s16 + $0x108] sm:$0xff] }
 0x50f   :  { %2586 = vmatprep.subr.bf16.mxu1 %v3338_v2  ;;  %v3348_v2 = vcombine.high %v1801_v63, %v1805_v0 }
 0x512   :  { %2587 = vmatpush1.bf16.msra.mxu1 %v3337_v3  ;;  %v3340_v3 = vcombine.high %v1793_v41, %v1797_v45 }
 0x513   :  { %2588 = vmatprep.subr.bf16.mxu1 %v3330_v7  ;;  %v3339_v7 = vcombine.low %v1793_v41, %v1797_v45  ;;  %v1827_v41 = vld [vmem:[%s5233_s16 + $0x1d8] sm:$0xff] }
 0x516   :  { %2589 = vmatpush1.bf16.msra.mxu1 %v3329_v8  ;;  %v3332_v8 = vcombine.high %v1785_v4, %v1789_v5 }
 0x517   :  { %2590 = vmatprep.subr.bf16.mxu1 %v3322_v11  ;;  %v3331_v11 = vcombine.low %v1785_v4, %v1789_v5 }
 0x51a   :  { %2591 = vmatpush1.bf16.msra.mxu1 %v3321_v12  ;;  %v3324_v12 = vcombine.high %v1777_v9, %v1781_v10 }
 0x51b   :  { %2592 = vmatprep.subr.bf16.mxu1 %v3314_v15  ;;  %v3323_v15 = vcombine.low %v1777_v9, %v1781_v10 }
 0x51e   :  { %2593 = vmatpush1.bf16.msra.mxu1 %v3313_v16  ;;  %v3316_v16 = vcombine.high %v1769_v13, %v1773_v14 }
 0x51f   :  { %2594 = vmatprep.subr.bf16.mxu1 %v3434_v18  ;;  %v3315_v18 = vcombine.low %v1769_v13, %v1773_v14 }
 0x522   :  { %2595 = vmatpush2.bf16.msra.mxu1 %v3433_v19  ;;  %v3436_v19 = vcombine.high %v1889_v39, %v1893_v17 }
 0x523   :  { %2596 = vmatprep.subr.bf16.mxu1 %v3426_v22  ;;  %v3435_v22 = vcombine.low %v1889_v39, %v1893_v17  ;;  %v1818_v39 = vld [vmem:[%s5233_s16 + $0x190] sm:$0xff] }
 0x526   :  { %2597 = vmatpush2.bf16.msra.mxu1 %v3425_v6  ;;  %v3428_v6 = vcombine.high %v1881_v20, %v1885_v21 }
 0x527   :  { %2598 = vmatprep.subr.bf16.mxu1 %v3418_v25  ;;  %v3427_v25 = vcombine.low %v1881_v20, %v1885_v21  ;;  %v1823_v20 = vld [vmem:[%s5233_s16 + $0x1b8] sm:$0xff] }
 0x52a   :  { %2599 = vmatpush2.bf16.msra.mxu1 %v3417_v26  ;;  %v3420_v26 = vcombine.high %v1873_v23, %v1877_v24 }
 0x52b   :  { %2600 = vmatprep.subr.bf16.mxu1 %v3410_v29  ;;  %v3419_v29 = vcombine.low %v1873_v23, %v1877_v24 }
 0x52e   :  { %2601 = vmatpush2.bf16.msra.mxu1 %v3409_v30  ;;  %v3412_v30 = vcombine.high %v1865_v27, %v1869_v28 }
 0x52f   :  { %2602 = vmatprep.subr.bf16.mxu1 %v3402_v33  ;;  %v3411_v33 = vcombine.low %v1865_v27, %v1869_v28  ;;  %v1815_v27 = vld [vmem:[%s5233_s16 + $0x178] sm:$0xff] }
 0x532   :  { %2603 = vmatpush2.bf16.msra.mxu1 %v3401_v34  ;;  %v3404_v34 = vcombine.high %v1857_v31, %v1861_v32 }
 0x533   :  { %2604 = vmatprep.subr.bf16.mxu1 %v3394_v37  ;;  %v3403_v37 = vcombine.low %v1857_v31, %v1861_v32  ;;  %v1802_v32 = vld [vmem:[%s5233_s16 + $0x110] sm:$0xff] }
 0x536   :  { %2605 = vmatpush2.bf16.msra.mxu1 %v3393_v38  ;;  %v3396_v38 = vcombine.high %v1849_v35, %v1853_v36 }
 0x5c1   :  { %v1607_v43 = vpop.f32.mrf.mxu1 }
 0x5c2   :  { %v1608_v44 = vadd.f32 %v3291_v40, %v1607_v43  ;;  %v3395_v40 = vcombine.low %v1849_v35, %v1853_v36  ;;  %v1840_v43 = vld [vmem:[%s5233_s16 + $0x240] sm:$0xff]  ;;  %v1807_v35 = vld [vmem:[%s5233_s16 + $0x138] sm:$0xff] }
 0x5c3   :  { %v3539_v46 = vpop.f32.mrf.mxu1 }
 0x5c4   :  { %v1613_v51 = vmax.f32 %v1608_v44, 0.0  ;;  %v1844_v44 = vld [vmem:[%s5233_s16 + $0x260] sm:$0xff]  ;;  %v1841_v46 = vld [vmem:[%s5233_s16 + $0x248] sm:$0xff] }
 0x5c5   :  { %v1610_v52 = vpop.f32.mrf.mxu1  ;;  %v3386_v47 = vcombine.high %v1840_v43, %v1844_v44 }
 0x5c6   :  { %v1614_v53 = vpack.c.bf16 %v1613_v51, %v1613_v51  ;;  %v3385_v51 = vcombine.low %v1840_v43, %v1844_v44  ;;  %v3387_v52 = vcombine.low %v1841_v46, %v1845_v50  ;;  %v1794_v43 = vld [vmem:[%s5233_s16 + $0xd0] sm:$0xff] }
 0x5c7   :  { %v3540_v58 = vpop.f32.mrf.mxu1  ;;  %2606 = vmatprep.subr.bf16.mxu1 %v3386_v47  ;;  %v1798_v44 = vld [vmem:[%s5233_s16 + $0xf0] sm:$0xff]  ;;  %v1799_v47 = vld [vmem:[%s5233_s16 + $0xf8] sm:$0xff] }
 0x5c8   :  { %1756 = vmatmul.mubr.bf16.vlgmr.msra.gmra.mxu0 %v1614_v53  ;;  %v3388_v53 = vcombine.high %v1841_v46, %v1845_v50  ;;  %2607 = vmatpush2.bf16.msra.mxu1 %v3385_v51  ;;  %v1836_v58 = vld [vmem:[%s5233_s16 + $0x220] sm:$0xff]  ;;  %v1795_v46 = vld [vmem:[%s5233_s16 + $0xd8] sm:$0xff] }
 0x5c9   :  { %2620 = vmatpush1.bf16.msra.mxu0 %v3371_v48  ;;  %v3347_v48 = vcombine.low %v1801_v63, %v1805_v0 }
 0x5ca   :  { %2621 = vmatprep.subr.bf16.mxu0 %v3364_v55  ;;  %v1832_v55 = vld [vmem:[%s5233_s16 + $0x200] sm:$0xff] }
 0x5cb   :  { %v3378_v60 = vcombine.high %v1832_v55, %v1836_v58 }
 0x5cd   :  { %2622 = vmatpush1.bf16.msra.mxu0 %v3363_v61  ;;  %v1837_v61 = vld [vmem:[%s5233_s16 + $0x228] sm:$0xff]  ;;  %2608 = vmatprep.subr.bf16.mxu1 %v3378_v60  ;;  %v1791_v60 = vld [vmem:[%s5233_s16 + $0xb8] sm:$0xff] }
 0x5ce   :  { %2623 = vmatprep.subr.bf16.mxu0 %v3356_v62  ;;  %v3377_v62 = vcombine.low %v1832_v55, %v1836_v58  ;;  %v3379_v63 = vcombine.low %v1833_v59, %v1837_v61  ;;  %v3380_v0 = vcombine.high %v1833_v59, %v1837_v61  ;;  %v1786_v55 = vld [vmem:[%s5233_s16 + $0x90] sm:$0xff]  ;;  %v1787_v59 = vld [vmem:[%s5233_s16 + $0x98] sm:$0xff]  ;;  %v3341_v61 = vcombine.low %v1794_v43, %v1798_v44 }
 0x5cf   :  { %v1790_v58 = vld [vmem:[%s5233_s16 + $0xb0] sm:$0xff] }
 0x5d0   :  { %2609 = vmatpush2.bf16.msra.mxu1 %v3377_v62  ;;  %v3343_v62 = vcombine.low %v1795_v46, %v1799_v47 }
 0x5d1   :  { %2624 = vmatpush1.bf16.msra.mxu0 %v3355_v1  ;;  %v1826_v1 = vld [vmem:[%s5233_s16 + $0x1d0] sm:$0xff] }
 0x5d2   :  { %2625 = vmatprep.subr.bf16.mxu0 %v3348_v2  ;;  %v1830_v2 = vld [vmem:[%s5233_s16 + $0x1f0] sm:$0xff] }
 0x5d3   :  { %v3374_v45 = vcombine.high %v1826_v1, %v1830_v2 }
 0x5d5   :  { %2626 = vmatpush1.bf16.msra.mxu0 %v3347_v48  ;;  %v1831_v48 = vld [vmem:[%s5233_s16 + $0x1f8] sm:$0xff]  ;;  %2660 = vmatprep.subr.bf16.mxu1 %v3374_v45 }
 0x5d6   :  { %2627 = vmatprep.subr.bf16.mxu0 %v3340_v3  ;;  %v3373_v3 = vcombine.low %v1826_v1, %v1830_v2  ;;  %v3375_v4 = vcombine.low %v1827_v41, %v1831_v48  ;;  %v3376_v5 = vcombine.high %v1827_v41, %v1831_v48  ;;  %v1778_v1 = vld [vmem:[%s5233_s16 + $0x50] sm:$0xff]  ;;  %v1779_v41 = vld [vmem:[%s5233_s16 + $0x58] sm:$0xff]  ;;  %v3333_v48 = vcombine.low %v1786_v55, %v1790_v58 }
 0x5d7   :  { %v1782_v2 = vld [vmem:[%s5233_s16 + $0x70] sm:$0xff]  ;;  %v1783_v45 = vld [vmem:[%s5233_s16 + $0x78] sm:$0xff] }
 0x5d9   :  { %2628 = vmatpush1.bf16.msra.mxu0 %v3339_v7  ;;  %v1631_v7 = vld [vmem:[%s5232_s15] sm:$0x3] }
 0x5da   :  { %2629 = vmatprep.subr.bf16.mxu0 %v3332_v8  ;;  %v1636_v8 = vrot.slane %v1631_v7, %v4453_v54  ;;  %v1640_v9 = vrot.slane %v1631_v7, %v4459_v56  ;;  %v1770_v7 = vld [vmem:[%s5233_s16 + $0x10] sm:$0xff] }
 0x5dd   :  { %2630 = vmatpush1.bf16.msra.mxu0 %v3331_v11 }
 0x5de   :  { %2631 = vmatprep.subr.bf16.mxu0 %v3324_v12 }
 0x5e1   :  { %2632 = vmatpush1.bf16.msra.mxu0 %v3323_v15 }
 0x5e2   :  { %2633 = vmatprep.subr.bf16.mxu0 %v3316_v16 }
 0x5e5   :  { %2634 = vmatpush1.bf16.msra.mxu0 %v3315_v18  ;;  %v1822_v18 = vld [vmem:[%s5233_s16 + $0x1b0] sm:$0xff] }
 0x5e6   :  { %2635 = vmatprep.subr.bf16.mxu0 %v3436_v19  ;;  %v1819_v19 = vld [vmem:[%s5233_s16 + $0x198] sm:$0xff]  ;;  %v3366_v23 = vcombine.high %v1818_v39, %v1822_v18  ;;  %v3365_v28 = vcombine.low %v1818_v39, %v1822_v18 }
 0x5e7   :  { %v3368_v24 = vcombine.high %v1819_v19, %v1823_v20  ;;  %v1891_v39 = vld [vmem:[%s5233_s16 + $0x3d8] sm:$0xff] }
 0x5e9   :  { %2636 = vmatpush2.bf16.msra.mxu0 %v3435_v22 }
 0x5ea   :  { %2637 = vmatprep.subr.bf16.mxu0 %v3428_v6  ;;  %v1810_v6 = vld [vmem:[%s5233_s16 + $0x150] sm:$0xff] }
 0x5ed   :  { %2638 = vmatpush2.bf16.msra.mxu0 %v3427_v25  ;;  %v1814_v25 = vld [vmem:[%s5233_s16 + $0x170] sm:$0xff] }
 0x5ee   :  { %2639 = vmatprep.subr.bf16.mxu0 %v3420_v26  ;;  %v1811_v26 = vld [vmem:[%s5233_s16 + $0x158] sm:$0xff]  ;;  %v3357_v36 = vcombine.low %v1810_v6, %v1814_v25 }
 0x5ef   :  { %v3360_v31 = vcombine.high %v1811_v26, %v1815_v27 }
 0x5f1   :  { %2640 = vmatpush2.bf16.msra.mxu0 %v3419_v29  ;;  %v3367_v29 = vcombine.low %v1819_v19, %v1823_v20 }
 0x5f2   :  { %2641 = vmatprep.subr.bf16.mxu0 %v3412_v30  ;;  %v3358_v30 = vcombine.high %v1810_v6, %v1814_v25  ;;  %v1882_v6 = vld [vmem:[%s5233_s16 + $0x390] sm:$0xff]  ;;  %v1887_v25 = vld [vmem:[%s5233_s16 + $0x3b8] sm:$0xff] }
 0x5f5   :  { %2642 = vmatpush2.bf16.msra.mxu0 %v3411_v33  ;;  %v1806_v33 = vld [vmem:[%s5233_s16 + $0x130] sm:$0xff] }
 0x5f6   :  { %2643 = vmatprep.subr.bf16.mxu0 %v3404_v34  ;;  %v1803_v34 = vld [vmem:[%s5233_s16 + $0x118] sm:$0xff]  ;;  %v3349_v50 = vcombine.low %v1802_v32, %v1806_v33 }
 0x5f7   :  { %v3351_v51 = vcombine.low %v1803_v34, %v1807_v35 }
 0x5f9   :  { %2644 = vmatpush2.bf16.msra.mxu0 %v3403_v37  ;;  %v3359_v37 = vcombine.low %v1811_v26, %v1815_v27 }
 0x5fa   :  { %2645 = vmatprep.subr.bf16.mxu0 %v3396_v38  ;;  %v3350_v38 = vcombine.high %v1802_v32, %v1806_v33  ;;  %v1875_v32 = vld [vmem:[%s5233_s16 + $0x358] sm:$0xff] }
 0x5fb   :  { %v1879_v33 = vld [vmem:[%s5233_s16 + $0x378] sm:$0xff] }
 0x5fd   :  { %2646 = vmatpush2.bf16.msra.mxu0 %v3395_v40  ;;  %v3352_v40 = vcombine.high %v1803_v34, %v1807_v35 }
 0x5fe   :  { %2647 = vmatprep.subr.bf16.mxu0 %v3388_v53  ;;  %v3344_v53 = vcombine.high %v1795_v46, %v1799_v47  ;;  %v3423_v47 = vcombine.low %v1875_v32, %v1879_v33 }
 0x601   :  { %2648 = vmatpush2.bf16.msra.mxu0 %v3387_v52  ;;  %v3342_v52 = vcombine.high %v1794_v43, %v1798_v44  ;;  %v1867_v43 = vld [vmem:[%s5233_s16 + $0x318] sm:$0xff] }
 0x602   :  { %2649 = vmatprep.subr.bf16.mxu0 %v3380_v0  ;;  %v3336_v0 = vcombine.high %v1787_v59, %v1791_v60  ;;  %v1871_v44 = vld [vmem:[%s5233_s16 + $0x338] sm:$0xff] }
 0x605   :  { %2650 = vmatpush2.bf16.msra.mxu0 %v3379_v63  ;;  %v3334_v63 = vcombine.high %v1786_v55, %v1790_v58  ;;  %v1859_v55 = vld [vmem:[%s5233_s16 + $0x2d8] sm:$0xff] }
 0x606   :  { %2701 = vmatprep.subr.bf16.mxu0 %v3376_v5  ;;  %v3328_v5 = vcombine.high %v1779_v41, %v1783_v45  ;;  %v1863_v58 = vld [vmem:[%s5233_s16 + $0x2f8] sm:$0xff] }
 0x688   :  { %v1757_v10 = vpop.f32.mrf.mxu0 }
 0x689   :  { %v1758_v11 = vadd.f32 %v1757_v10, %v1636_v8  ;;  %v1774_v8 = vld [vmem:[%s5233_s16 + $0x30] sm:$0xff]  ;;  %v1775_v10 = vld [vmem:[%s5233_s16 + $0x38] sm:$0xff] }
 0x68a   :  { %v1759_v12 = vpop.f32.mrf.mxu0  ;;  %v3317_v18 = vcombine.low %v1770_v7, %v1774_v8 }
 0x68b   :  { %v1760_v13 = vadd.f32 %v1759_v12, %v1640_v9  ;;  %v1764_v14 = vmax.f32 %v1758_v11, 0.0  ;;  %v1771_v9 = vld [vmem:[%s5233_s16 + $0x18] sm:$0xff]  ;;  %v3325_v11 = vcombine.low %v1778_v1, %v1782_v2  ;;  %v3327_v12 = vcombine.low %v1779_v41, %v1783_v45 }
 0x68c   :  { %v1761_v15 = vpop.f32.mrf.mxu0  ;;  %v3319_v19 = vcombine.low %v1771_v9, %v1775_v10  ;;  %v3407_v45 = vcombine.low %v1859_v55, %v1863_v58 }
 0x68d   :  { %v1765_v16 = vmax.f32 %v1760_v13, 0.0  ;;  %v4826_v22 = vpack.c.bf16 %v1764_v14, %v1764_v14  ;;  %v3318_v13 = vcombine.high %v1770_v7, %v1774_v8  ;;  %v3320_v14 = vcombine.high %v1771_v9, %v1775_v10  ;;  %v1890_v15 = vld [vmem:[%s5233_s16 + $0x3d0] sm:$0xff]  ;;  %v1843_v7 = vld [vmem:[%s5233_s16 + $0x258] sm:$0xff] }
 0x68e   :  { %v1762_v17 = vpop.f32.mrf.mxu0  ;;  %v1847_v8 = vld [vmem:[%s5233_s16 + $0x278] sm:$0xff] }
 0x68f   :  { %v1767_v21 = vpack.c.bf16 %v1765_v16, %v1765_v16  ;;  %v1894_v16 = vld [vmem:[%s5233_s16 + $0x3f0] sm:$0xff]  ;;  %v1895_v17 = vld [vmem:[%s5233_s16 + $0x3f8] sm:$0xff] }
 0x690   :  { %v3438_v20 = vcombine.high %v1890_v15, %v1894_v16  ;;  %v3437_v26 = vcombine.low %v1890_v15, %v1894_v16  ;;  %v3439_v27 = vcombine.low %v1891_v39, %v1895_v17  ;;  %v1835_v15 = vld [vmem:[%s5233_s16 + $0x218] sm:$0xff] }
 0x691   :  { %2610 = vmatprep.mubr.bf16.mxu1 %v1767_v21  ;;  %2651 = vmatprep.mubr.bf16.mxu0 %v1767_v21  ;;  %v1839_v16 = vld [vmem:[%s5233_s16 + $0x238] sm:$0xff] }
 0x692   :  { %2611 = vmatmul.mubr.bf16.vlgmr.msra.gmra.mxu1 %v4826_v22  ;;  %2652 = vmatmul.mubr.bf16.vlgmr.msra.gmra.mxu0 %v4826_v22 }
 0x693   :  { %2661 = vmatpush1.bf16.msra.mxu1 %v3373_v3  ;;  %2702 = vmatpush1.bf16.msra.mxu0 %v3375_v4  ;;  %v3335_v3 = vcombine.low %v1787_v59, %v1791_v60  ;;  %v3326_v4 = vcombine.high %v1778_v1, %v1782_v2  ;;  %v3415_v60 = vcombine.low %v1867_v43, %v1871_v44  ;;  %v1851_v1 = vld [vmem:[%s5233_s16 + $0x298] sm:$0xff] }
 0x694   :  { %2692 = vmatprep.mubr.bf16.mxu1 %v1767_v21  ;;  %2733 = vmatprep.mubr.bf16.mxu0 %v1767_v21  ;;  %v3440_v21 = vcombine.high %v1891_v39, %v1895_v17  ;;  %v1855_v2 = vld [vmem:[%s5233_s16 + $0x2b8] sm:$0xff]  ;;  %v3391_v17 = vcombine.low %v1843_v7, %v1847_v8 }
 0x695   :  { %2662 = vmatprep.subr.bf16.mxu1 %v3366_v23  ;;  %2703 = vmatprep.subr.bf16.mxu0 %v3368_v24  ;;  %v1886_v23 = vld [vmem:[%s5233_s16 + $0x3b0] sm:$0xff]  ;;  %v1883_v24 = vld [vmem:[%s5233_s16 + $0x398] sm:$0xff]  ;;  %v3399_v10 = vcombine.low %v1851_v1, %v1855_v2 }
 0x696   :  { %v3429_v34 = vcombine.low %v1882_v6, %v1886_v23  ;;  %v3431_v35 = vcombine.low %v1883_v24, %v1887_v25 }
 0x697   :  { %2663 = vmatpush1.bf16.msra.mxu1 %v3365_v28  ;;  %2704 = vmatpush1.bf16.msra.mxu0 %v3367_v29  ;;  %v3430_v28 = vcombine.high %v1882_v6, %v1886_v23  ;;  %v3432_v29 = vcombine.high %v1883_v24, %v1887_v25 }
 0x698   :  { %2664 = vmatprep.subr.bf16.mxu1 %v3358_v30  ;;  %2705 = vmatprep.subr.bf16.mxu0 %v3360_v31  ;;  %v1874_v30 = vld [vmem:[%s5233_s16 + $0x350] sm:$0xff] }
 0x699   :  { %v1878_v31 = vld [vmem:[%s5233_s16 + $0x370] sm:$0xff] }
 0x69a   :  { %v3421_v46 = vcombine.low %v1874_v30, %v1878_v31 }
 0x69b   :  { %2665 = vmatpush1.bf16.msra.mxu1 %v3357_v36  ;;  %2706 = vmatpush1.bf16.msra.mxu0 %v3359_v37  ;;  %v3422_v36 = vcombine.high %v1874_v30, %v1878_v31  ;;  %v3424_v37 = vcombine.high %v1875_v32, %v1879_v33  ;;  %v1896_v30 = vld [vmem:[%s5234_s17] sm:$0xff]  ;;  %v1908_v32 = vsub.s32 2, %v4097_v42 }
 0x69c   :  { %2666 = vmatprep.subr.bf16.mxu1 %v3350_v38  ;;  %2707 = vmatprep.subr.bf16.mxu0 %v3352_v40  ;;  %v1866_v38 = vld [vmem:[%s5233_s16 + $0x310] sm:$0xff]  ;;  %v1905_v31 = vrot.slane %v1896_v30, %v4459_v56  ;;  %v1901_v33 = vrot.slane %v1896_v30, %v4453_v54 }
 0x69d   :  { %v1870_v40 = vld [vmem:[%s5233_s16 + $0x330] sm:$0xff] }
 0x69e   :  { %v3413_v59 = vcombine.low %v1866_v38, %v1870_v40 }
 0x69f   :  { %2667 = vmatpush1.bf16.msra.mxu1 %v3349_v50  ;;  %2708 = vmatpush1.bf16.msra.mxu0 %v3351_v51  ;;  %v3414_v50 = vcombine.high %v1866_v38, %v1870_v40  ;;  %v3416_v51 = vcombine.high %v1867_v43, %v1871_v44 }
 0x6a0   :  { %2668 = vmatprep.subr.bf16.mxu1 %v3342_v52  ;;  %2709 = vmatprep.subr.bf16.mxu0 %v3344_v53  ;;  %v1858_v52 = vld [vmem:[%s5233_s16 + $0x2d0] sm:$0xff] }
 0x6a1   :  { %v1862_v53 = vld [vmem:[%s5233_s16 + $0x2f0] sm:$0xff] }
 0x6a2   :  { %v3405_v41 = vcombine.low %v1858_v52, %v1862_v53 }
 0x6a3   :  { %2669 = vmatpush1.bf16.msra.mxu1 %v3341_v61  ;;  %2710 = vmatpush1.bf16.msra.mxu0 %v3343_v62  ;;  %v3406_v61 = vcombine.high %v1858_v52, %v1862_v53  ;;  %v3408_v62 = vcombine.high %v1859_v55, %v1863_v58 }
 0x6a4   :  { %2670 = vmatprep.subr.bf16.mxu1 %v3334_v63  ;;  %2711 = vmatprep.subr.bf16.mxu0 %v3336_v0  ;;  %v1850_v63 = vld [vmem:[%s5233_s16 + $0x290] sm:$0xff] }
 0x6a5   :  { %v1854_v0 = vld [vmem:[%s5233_s16 + $0x2b0] sm:$0xff] }
 0x6a6   :  { %v3397_v9 = vcombine.low %v1850_v63, %v1854_v0 }
 0x6a7   :  { %2671 = vmatpush1.bf16.msra.mxu1 %v3333_v48  ;;  %2712 = vmatpush1.bf16.msra.mxu0 %v3335_v3  ;;  %v3398_v48 = vcombine.high %v1850_v63, %v1854_v0  ;;  %v3400_v3 = vcombine.high %v1851_v1, %v1855_v2  ;;  %v1916_v0 = vsub.s32 4, %v4097_v42  ;;  %v1924_v1 = vsub.s32 6, %v4097_v42 }
 0x6a8   :  { %2672 = vmatprep.subr.bf16.mxu1 %v3326_v4  ;;  %2713 = vmatprep.subr.bf16.mxu0 %v3328_v5  ;;  %v1842_v4 = vld [vmem:[%s5233_s16 + $0x250] sm:$0xff] }
 0x6a9   :  { %v1846_v5 = vld [vmem:[%s5233_s16 + $0x270] sm:$0xff] }
 0x6aa   :  { %v3389_v39 = vcombine.low %v1842_v4, %v1846_v5 }
 0x6ab   :  { %2673 = vmatpush1.bf16.msra.mxu1 %v3325_v11  ;;  %2714 = vmatpush1.bf16.msra.mxu0 %v3327_v12  ;;  %v3390_v11 = vcombine.high %v1842_v4, %v1846_v5  ;;  %v3392_v12 = vcombine.high %v1843_v7, %v1847_v8  ;;  %v1925_v4 = vrot.slane %v1896_v30, %v1924_v1 }
 0x6ac   :  { %2674 = vmatprep.subr.bf16.mxu1 %v3318_v13  ;;  %2715 = vmatprep.subr.bf16.mxu0 %v3320_v14  ;;  %v1834_v13 = vld [vmem:[%s5233_s16 + $0x210] sm:$0xff] }
 0x6ad   :  { %v1838_v14 = vld [vmem:[%s5233_s16 + $0x230] sm:$0xff] }
 0x6af   :  { %2675 = vmatpush1.bf16.msra.mxu1 %v3317_v18  ;;  %2716 = vmatpush1.bf16.msra.mxu0 %v3319_v19  ;;  %v3382_v18 = vcombine.high %v1834_v13, %v1838_v14  ;;  %v3384_v19 = vcombine.high %v1835_v15, %v1839_v16 }
 0x6b0   :  { %2676 = vmatprep.subr.bf16.mxu1 %v3438_v20  ;;  %2717 = vmatprep.subr.bf16.mxu0 %v3440_v21  ;;  %v3381_v20 = vcombine.low %v1834_v13, %v1838_v14  ;;  %v3383_v21 = vcombine.low %v1835_v15, %v1839_v16 }
 0x6b3   :  { %2677 = vmatpush2.bf16.msra.mxu1 %v3437_v26  ;;  %2718 = vmatpush2.bf16.msra.mxu0 %v3439_v27 }
 0x6b4   :  { %2678 = vmatprep.subr.bf16.mxu1 %v3430_v28  ;;  %2719 = vmatprep.subr.bf16.mxu0 %v3432_v29 }
 0x6b7   :  { %2679 = vmatpush2.bf16.msra.mxu1 %v3429_v34  ;;  %2720 = vmatpush2.bf16.msra.mxu0 %v3431_v35  ;;  %v1909_v35 = vrot.slane %v1896_v30, %v1908_v32 }
 0x6b8   :  { %2680 = vmatprep.subr.bf16.mxu1 %v3422_v36  ;;  %2721 = vmatprep.subr.bf16.mxu0 %v3424_v37 }
 0x6bb   :  { %2681 = vmatpush2.bf16.msra.mxu1 %v3421_v46  ;;  %2722 = vmatpush2.bf16.msra.mxu0 %v3423_v47 }
 0x6bc   :  { %2682 = vmatprep.subr.bf16.mxu1 %v3414_v50  ;;  %2723 = vmatprep.subr.bf16.mxu0 %v3416_v51 }
 0x6bf   :  { %2683 = vmatpush2.bf16.msra.mxu1 %v3413_v59  ;;  %2724 = vmatpush2.bf16.msra.mxu0 %v3415_v60 }
 0x6c0   :  { %2684 = vmatprep.subr.bf16.mxu1 %v3406_v61  ;;  %2725 = vmatprep.subr.bf16.mxu0 %v3408_v62 }
 0x6c3   :  { %2685 = vmatpush2.bf16.msra.mxu1 %v3405_v41  ;;  %2726 = vmatpush2.bf16.msra.mxu0 %v3407_v45  ;;  %v1920_v45 = vsub.s32 5, %v4097_v42 }
 0x6c4   :  { %2686 = vmatprep.subr.bf16.mxu1 %v3398_v48  ;;  %2727 = vmatprep.subr.bf16.mxu0 %v3400_v3  ;;  %v1928_v48 = vsub.s32 7, %v4097_v42  ;;  %v1917_v3 = vrot.slane %v1896_v30, %v1916_v0 }
 0x6c7   :  { %2687 = vmatpush2.bf16.msra.mxu1 %v3397_v9  ;;  %2728 = vmatpush2.bf16.msra.mxu0 %v3399_v10 }
 0x6c8   :  { %2688 = vmatprep.subr.bf16.mxu1 %v3390_v11  ;;  %2729 = vmatprep.subr.bf16.mxu0 %v3392_v12  ;;  %v1921_v11 = vrot.slane %v1896_v30, %v1920_v45  ;;  %v1929_v12 = vrot.slane %v1896_v30, %v1928_v48 }
 0x6cb   :  { %2689 = vmatpush2.bf16.msra.mxu1 %v3389_v39  ;;  %2730 = vmatpush2.bf16.msra.mxu0 %v3391_v17 }
 0x6cc   :  { %2690 = vmatprep.subr.bf16.mxu1 %v3382_v18  ;;  %2731 = vmatprep.subr.bf16.mxu0 %v3384_v19 }
 0x6cf   :  { %2691 = vmatpush2.bf16.msra.mxu1 %v3381_v20  ;;  %2732 = vmatpush2.bf16.msra.mxu0 %v3383_v21 }
 0x6d2   :  { %2693 = vmatmul.mubr.bf16.vlgmr.msra.gmra.mxu1 %v4826_v22  ;;  %2734 = vmatmul.mubr.bf16.vlgmr.msra.gmra.mxu0 %v4826_v22  ;;  %v1912_v22 = vsub.s32 3, %v4097_v42 }
 0x6d4   :  { %v1913_v37 = vrot.slane %v1896_v30, %v1912_v22 }
 0x752   :  { %v2612_v6 = vpop.f32.mrf.mxu1  ;;  %v2653_v23 = vpop.f32.mrf.mxu0 }
 0x753   :  { %v5009_v36 = vadd.f32 %v2612_v6, %v1901_v33  ;;  %v5012_v40 = vadd.f32 %v2653_v23, %v1909_v35 }
 0x754   :  { %v2614_v24 = vpop.f32.mrf.mxu1  ;;  %v2655_v25 = vpop.f32.mrf.mxu0 }
 0x755   :  { %v5007_v34 = vadd.f32 %v2614_v24, %v1905_v31  ;;  %v2742_v43 = vand.u32 2147483647, %v5009_v36  ;;  %v5015_v44 = vadd.f32 %v2655_v25, %v1913_v37  ;;  %v2744_v46 = vand.u32 2147483647, %v5012_v40  ;;  %v5055_v24 = vld [vmem:[%s5244_s26] sm:$0xff]  ;;  %s3879_s26 = smov [#allocation2]  }
 0x756   :  { %v2616_v26 = vpop.f32.mrf.mxu1  ;;  %v2657_v27 = vpop.f32.mrf.mxu0  ;;  %v2882_v35 = vunpack.c.l.bf16 %v5055_v24  ;;  %vm2790_vm4 = vcmp.ge.f32.partialorder %v5009_v36, 0.0  ;;  %vm2792_vm8 = vcmp.ge.f32.partialorder %v5012_v40, 0.0  ;;  %s3115_s1 = sshll.u32 %s3879_s26, 4  ;;  %s3116_s1 = int_to_ptr.vmem [resolvable:$true] %s3115_s1 }
 0x757   :  { %v2743_v38 = vand.u32 2147483647, %v5007_v34  ;;  %v2750_v54 = vsub.f32 0.0, %v2742_v43  ;;  %v2745_v47 = vand.u32 2147483647, %v5015_v44  ;;  %v2752_v51 = vsub.f32 0.0, %v2744_v46  ;;  %p3855_p1 = scmp.lt.s32.totalorder %s3116_s1, %s3116_s1 }
 0x758   :  { %v2617_v28 = vpop.f32.mrf.mxu1  ;;  %v2658_v29 = vpop.f32.mrf.mxu0  ;;  %v2980_v7 = vcombine.low %v5009_v36, %v5007_v34  ;;  %v2981_v8 = vcombine.low %v5012_v40, %v5015_v44  ;;  %vm2791_vm5 = vcmp.ge.f32.partialorder %v5007_v34, 0.0  ;;  %vm2793_vm7 = vcmp.ge.f32.partialorder %v5015_v44, 0.0  ;;  %s3850_s22 = scalar_lea.vmem %s3116_s1, 128 }
 0x759   :  { %v2751_v56 = vsub.f32 0.0, %v2743_v38  ;;  %v2758_v52 = vmul.f32 1.442695, %v2750_v54  ;;  %v2753_v53 = vsub.f32 0.0, %v2745_v47  ;;  %v2762_v55 = vmul.f32 1.442695, %v2752_v51  ;;  %p3851_p0 = scmp.ne.s32.totalorder %s3116_s1, %s3850_s22  ;;  %p3856_p2 = scmp.lt.s32.totalorder %s3850_s22, %s3850_s22 }
 0x75a   :  { %v2988_v16 = vrot.slane %v2980_v7, %v4516_v57  ;;  %v2995_v18 = vrot.slane %v2981_v8, %v4516_v57  ;;  %v2884_v54 = vmax.f32 %v5009_v36, 0.0 }
 0x75b   :  { %v2760_v50 = vmul.f32 1.442695, %v2751_v56  ;;  %v2764_v58 = vmul.f32 1.442695, %v2753_v53  ;;  %p3857_p3 = por %p3856_p2, %p3855_p1 }
 0x75c   :  { %v2996_v37 = vcombine.low %v2988_v16, %v2995_v18 }
 0x75d   :  { %3802 = vpow2.f32 %v2760_v50  ;;  %p3858_p4 = pnand %p3857_p3, %p3851_p0 }
 0x75e   :  { %3804 = vpow2.f32 %v2758_v52  ;;  %v3016_v0 = vmul.f32 %v2996_v37, %v2882_v35 }
 0x75f   :  { %3806 = vpow2.f32 %v2762_v55 }
 0x760   :  { %3808 = vpow2.f32 %v2764_v58  ;;  %v3020_v16 = vcombine.high %v3016_v0, %v3016_v0 }
 0x76a   :  { %v5019_v59 = vpop.eup %3802 }
 0x76b   :  { %v5021_v60 = vpop.eup %3804  ;;  %v2775_v61 = vadd.f32 1.0, %v5019_v59  ;;  %v2904_v23 = vmul.f32 -0.5, %v5019_v59  ;;  %v2907_v47 = vand.u32 2147483647, %v5019_v59 }
 0x76c   :  { %v5024_v62 = vpop.eup %3806  ;;  %v2774_v63 = vadd.f32 1.0, %v5021_v60  ;;  %v2895_v27 = vmul.f32 -0.5, %v5021_v60 }
 0x76d   :  { %v5029_v2 = vpop.eup %3808  ;;  %3810 = vlog2.f32 %v2775_v61  ;;  %v2776_v41 = vadd.f32 1.0, %v5024_v62  ;;  %v2905_v43 = vadd.f32 1.0, %v2904_v23  ;;  %v2913_v52 = vmul.f32 -0.5, %v5024_v62 }
 0x76e   :  { %3812 = vlog2.f32 %v2774_v63  ;;  %v2777_v5 = vadd.f32 1.0, %v5029_v2  ;;  %v2896_v51 = vadd.f32 1.0, %v2895_v27  ;;  %v2922_v48 = vmul.f32 -0.5, %v5029_v2 }
 0x76f   :  { %3814 = vrcp.f32 %v2774_v63  ;;  %v2886_v63 = vmax.f32 %v5012_v40, 0.0  ;;  %v2906_v45 = vmul.f32 %v5019_v59, %v2905_v43  ;;  %vm5071_vm6 = vcmp.lt.f32.partialorder %v2907_v47, 0.0004427343 }
 0x770   :  { %3816 = vlog2.f32 %v2776_v41  ;;  %v2897_v8 = vmul.f32 %v5021_v60, %v2896_v51  ;;  %v2925_v23 = vand.u32 2147483647, %v5029_v2  ;;  %v3034_v43 = vrot.slane %v3020_v16, %v4516_v57 }
 0x771   :  { %3818 = vrcp.f32 %v2775_v61  ;;  %v2898_v61 = vand.u32 2147483647, %v5021_v60 }
 0x772   :  { %3820 = vrcp.f32 %v2777_v5  ;;  %vm5106_vm11 = vcmp.lt.f32.partialorder %v2925_v23, 0.0004427343 }
 0x773   :  { %3822 = vlog2.f32 %v2777_v5  ;;  %vm5081_vm9 = vcmp.lt.f32.partialorder %v2898_v61, 0.0004427343 }
 0x774   :  { %3824 = vrcp.f32 %v2776_v41 }
 0x77a   :  { %v3811_v22 = vpop.eup %3810 }
 0x77b   :  { %v3813_v46 = vpop.eup %3812  ;;  %v2903_v53 = vmul.f32 0.6931472, %v3811_v22 }
 0x77c   :  { %v3815_v58 = vpop.eup %3814  ;;  %v2894_v41 = vmul.f32 0.6931472, %v3813_v46 }
 0x77d   :  { %v3817_v1 = vpop.eup %3816 }
 0x77e   :  { %v2900_v18 = vsel %vm5081_vm9, %v2897_v8, %v2894_v41 }
 0x792   :  { %v2694_v9 = vpop.f32.mrf.mxu1  ;;  %v2735_v10 = vpop.f32.mrf.mxu0 }
 0x793   :  { %v5039_v13 = vadd.f32 %v2694_v9, %v1917_v3  ;;  %v5041_v42 = vadd.f32 %v2735_v10, %v1925_v4  ;;  %v3819_v3 = vpop.eup %3818  ;;  %v2885_v4 = vmax.f32 %v5007_v34, 0.0  ;;  %v2914_v9 = vadd.f32 1.0, %v2913_v52 }
 0x794   :  { %v2696_v14 = vpop.f32.mrf.mxu1  ;;  %v2737_v15 = vpop.f32.mrf.mxu0  ;;  %v2909_v10 = vsel %vm5071_vm6, %v2906_v45, %v2903_v53 }
 0x795   :  { %v2746_v39 = vand.u32 2147483647, %v5039_v13  ;;  %v2748_v17 = vand.u32 2147483647, %v5041_v42  ;;  %v5047_v19 = vadd.f32 %v2696_v14, %v1921_v11  ;;  %v5049_v20 = vadd.f32 %v2737_v15, %v1929_v12  ;;  %v3821_v7 = vpop.eup %3820 }
 0x796   :  { %v2698_v21 = vpop.f32.mrf.mxu1  ;;  %v2739_v6 = vpop.f32.mrf.mxu0  ;;  %v2887_v11 = vmax.f32 %v5015_v44, 0.0  ;;  %v2916_v15 = vand.u32 2147483647, %v5024_v62  ;;  %v2965_v27 = vadd.f32 %v2909_v10, %v2885_v4  ;;  %v3036_v4 = vcombine.high %v3034_v43, %v3034_v43 }
 0x797   :  { %v2754_v25 = vsub.f32 0.0, %v2746_v39  ;;  %v2756_v26 = vsub.f32 0.0, %v2748_v17  ;;  %v2747_v28 = vand.u32 2147483647, %v5047_v19  ;;  %v2749_v33 = vand.u32 2147483647, %v5049_v20  ;;  %v3823_v12 = vpop.eup %3822 }
 0x798   :  { %v2699_v29 = vpop.f32.mrf.mxu1  ;;  %v2740_v30 = vpop.f32.mrf.mxu0  ;;  %v3027_v39 = vrot.slane %v3016_v0, %v4516_v57  ;;  %v2912_v21 = vmul.f32 0.6931472, %v3817_v1  ;;  %v2923_v6 = vadd.f32 1.0, %v2922_v48  ;;  %vm5099_vm10 = vcmp.lt.f32.partialorder %v2916_v15, 0.0004427343 }
 0x799   :  { %v2766_v31 = vmul.f32 1.442695, %v2754_v25  ;;  %v2770_v32 = vmul.f32 1.442695, %v2756_v26  ;;  %v2755_v38 = vsub.f32 0.0, %v2747_v28  ;;  %v2757_v56 = vsub.f32 0.0, %v2749_v33  ;;  %v3825_v17 = vpop.eup %3824 }
 0x79a   :  { %v2798_v25 = vmul.f32 %v3815_v58, %v5021_v60  ;;  %v2799_v26 = vmul.f32 %v3819_v3, %v5019_v59  ;;  %v2801_v28 = vmul.f32 %v3821_v7, %v5029_v2  ;;  %v2915_v29 = vmul.f32 %v5024_v62, %v2914_v9 }
 0x79b   :  { %3826 = vpow2.f32 %v2766_v31  ;;  %v2768_v50 = vmul.f32 1.442695, %v2755_v38  ;;  %v2772_v55 = vmul.f32 1.442695, %v2757_v56  ;;  %v2921_v30 = vmul.f32 0.6931472, %v3823_v12 }
 0x79c   :  { %3828 = vpow2.f32 %v2770_v32  ;;  %v2997_v31 = vcombine.low %v5039_v13, %v5047_v19  ;;  %v2998_v32 = vcombine.low %v5041_v42, %v5049_v20  ;;  %v2964_v33 = vadd.f32 %v2900_v18, %v2884_v54 }
 0x79d   :  { %3830 = vpow2.f32 %v2768_v50  ;;  %v2800_v22 = vmul.f32 %v3825_v17, %v5024_v62  ;;  %v3035_v59 = vcombine.high %v3027_v39, %v3027_v39  ;;  %v2918_v60 = vsel %vm5099_vm10, %v2915_v29, %v2912_v21 }
 0x79e   :  { %3832 = vpow2.f32 %v2772_v55  ;;  %v2924_v37 = vmul.f32 %v5029_v2, %v2923_v6  ;;  %v2806_v62 = vsel %vm2790_vm4, %v3815_v58, %v2798_v25  ;;  %v2807_v46 = vsel %vm2791_vm5, %v3819_v3, %v2799_v26 }
 0x79f   :  { %v2809_v54 = vsel %vm2793_vm7, %v3821_v7, %v2801_v28  ;;  %v3063_v47 = vsub.f32 %v2965_v27, %v3035_v59  ;;  %v3005_v52 = vrot.slane %v2997_v31, %v4516_v57  ;;  %v3012_v53 = vrot.slane %v2998_v32, %v4516_v57 }
 0x7a0   :  { %v2927_v2 = vsel %vm5106_vm11, %v2924_v37, %v2921_v30  ;;  %v2808_v36 = vsel %vm2792_vm8, %v3825_v17, %v2800_v22  ;;  %v2966_v34 = vadd.f32 %v2918_v60, %v2886_v63  ;;  %v3062_v44 = vsub.f32 %v2964_v33, %v3027_v39 }
 0x7a1   :  { %v3441_v61 = vpack.c.bf16 %v2807_v46, %v2806_v62  ;;  %v3442_v0 = vpack.c.bf16 %v2809_v54, %v2808_v36  ;;  %v2967_v41 = vadd.f32 %v2927_v2, %v2887_v11  ;;  %v3072_v48 = vsel %vm3070_vm12, %v3063_v47, 0.0 }
 0x7a2   :  { %v3013_v63 = vcombine.low %v3005_v52, %v3012_v53  ;;  %v2883_v3 = vunpack.c.h.bf16 %v5055_v24  ;;  %v3064_v5 = vsub.f32 %v2966_v34, %v3034_v43  ;;  %v3071_v7 = vsel %vm3070_vm12, %v3062_v44, 0.0 }
 0x7a3   :  { %v3073_v8 = vadd.f32 %v3072_v48, %v3071_v7  ;;  %v3065_v9 = vsub.f32 %v2967_v41, %v3036_v4  ;;  %v5139_v10 = vrot.slane %v3441_v61, %v4115_v49  ;;  %v5142_v11 = vrot.slane %v3442_v0, %v4115_v49 }
 0x7a4   :  { %v3017_v12 = vmul.f32 %v3013_v63, %v2883_v3  ;;  %v3074_v24 = vsel %vm3070_vm12, %v3064_v5, 0.0  ;;  %vm2794_vm13 = vcmp.ge.f32.partialorder %v5039_v13, 0.0  ;;  %v2888_v18 = vmax.f32 %v5039_v13, 0.0 }
 0x7a5   :  { %v3075_v15 = vadd.f32 %v3074_v24, %v3073_v8  ;;  %v3076_v39 = vsel %vm3070_vm12, %v3065_v9, 0.0  ;;  %v2862_v17 = vcombine.low %v5139_v10, %v5142_v11  ;;  %vm2796_vm14 = vcmp.ge.f32.partialorder %v5041_v42, 0.0 }
 0x7a6   :  { %v3037_v6 = vcombine.high %v3017_v12, %v3017_v12  ;;  %v2890_v25 = vmax.f32 %v5041_v42, 0.0  ;;  %vm2795_vm15 = vcmp.ge.f32.partialorder %v5047_v19, 0.0  ;;  %v3044_v26 = vrot.slane %v3017_v12, %v4516_v57 }
 0x7a7   :  { %v3077_v30 = vadd.f32 %v3076_v39, %v3075_v15  ;;  %v2889_v32 = vmax.f32 %v5047_v19, 0.0  ;;  %vm2797_vm0 = vcmp.ge.f32.partialorder %v5049_v20, 0.0  ;;  %v2891_v59 = vmax.f32 %v5049_v20, 0.0 }
 0x7a8   :  { %v5111_v56 = vpop.eup %3826  ;;  %v3051_v38 = vrot.slane %v3037_v6, %v4516_v57  ;;  %v3052_v47 = vcombine.high %v3044_v26, %v3044_v26 }
 0x7a9   :  { %v5119_v50 = vpop.eup %3828  ;;  %v2778_v51 = vadd.f32 1.0, %v5111_v56  ;;  %v2931_v14 = vmul.f32 -0.5, %v5111_v56  ;;  %v2934_v27 = vand.u32 2147483647, %v5111_v56 }
 0x7aa   :  { %v2780_v55 = vadd.f32 1.0, %v5119_v50  ;;  %v5129_v58 = vpop.eup %3830  ;;  %v2949_v16 = vmul.f32 -0.5, %v5119_v50  ;;  %v2952_v29 = vand.u32 2147483647, %v5119_v50  ;;  %v3053_v6 = vcombine.high %v3051_v38, %v3051_v38 }
 0x7ab   :  { %3834 = vrcp.f32 %v2778_v51  ;;  %v5131_v1 = vpop.eup %3832  ;;  %v2779_v45 = vadd.f32 1.0, %v5129_v58  ;;  %v2940_v21 = vmul.f32 -0.5, %v5129_v58  ;;  %v2932_v23 = vadd.f32 1.0, %v2931_v14 }
 0x7ac   :  { %3836 = vlog2.f32 %v2778_v51  ;;  %v2781_v40 = vadd.f32 1.0, %v5131_v1  ;;  %v2943_v28 = vand.u32 2147483647, %v5129_v58  ;;  %v2950_v33 = vadd.f32 1.0, %v2949_v16 }
 0x7ad   :  { %3838 = vrcp.f32 %v2780_v55  ;;  %v2958_v22 = vmul.f32 -0.5, %v5131_v1  ;;  %v2941_v60 = vadd.f32 1.0, %v2940_v21  ;;  %v2961_v37 = vand.u32 2147483647, %v5131_v1 }
 0x7ae   :  { %3840 = vrcp.f32 %v2779_v45  ;;  %v2933_v54 = vmul.f32 %v5111_v56, %v2932_v23  ;;  %vm2935_vm1 = vcmp.lt.f32.partialorder %v2934_v27, 0.0004427343  ;;  %vm5169_vm2 = vcmp.lt.f32.partialorder %v2943_v28, 0.0004427343 }
 0x7af   :  { %3842 = vrcp.f32 %v2781_v40  ;;  %vm5173_vm3 = vcmp.lt.f32.partialorder %v2952_v29, 0.0004427343  ;;  %v2942_v41 = vmul.f32 %v5129_v58, %v2941_v60  ;;  %vm5181_vm4 = vcmp.lt.f32.partialorder %v2961_v37, 0.0004427343 }
 0x7b0   :  { %3844 = vlog2.f32 %v2779_v45 }
 0x7b1   :  { %3846 = vlog2.f32 %v2780_v55  ;;  %v2951_v55 = vmul.f32 %v5119_v50, %v2950_v33 }
 0x7b2   :  { %3848 = vlog2.f32 %v2781_v40 }
 0x7b8   :  { %v3835_v31 = vpop.eup %3834 }
 0x7b9   :  { %v3837_v35 = vpop.eup %3836  ;;  %v2802_v62 = vmul.f32 %v3835_v31, %v5111_v56  ;;  %v2959_v56 = vadd.f32 1.0, %v2958_v22 }
 0x7ba   :  { %v3839_v43 = vpop.eup %3838  ;;  %v2930_v46 = vmul.f32 0.6931472, %v3837_v35 }
 0x7bb   :  { %v3841_v2 = vpop.eup %3840  ;;  %v2804_v51 = vmul.f32 %v3839_v43, %v5119_v50  ;;  %v2810_v40 = vsel %vm2794_vm13, %v3835_v31, %v2802_v62  ;;  %v2960_v13 = vmul.f32 %v5131_v1, %v2959_v56  ;;  %v2870_v31 = vrot.slane %v2862_v17, %v4115_v49 }
 0x7bc   :  { %v3843_v57 = vpop.eup %3842  ;;  %v2936_v36 = vsel %vm2935_vm1, %v2933_v54, %v2930_v46  ;;  %v2803_v34 = vmul.f32 %v3841_v2, %v5129_v58 }
 0x7bd   :  { %v3845_v44 = vpop.eup %3844  ;;  %v2968_v61 = vadd.f32 %v2936_v36, %v2888_v18  ;;  %v2805_v0 = vmul.f32 %v3843_v57, %v5131_v1  ;;  %v2812_v63 = vsel %vm2796_vm14, %v3839_v43, %v2804_v51 }
 0x7be   :  { %v3847_v48 = vpop.eup %3846  ;;  %v2811_v50 = vsel %vm2795_vm15, %v3841_v2, %v2803_v34  ;;  %v2939_v3 = vmul.f32 0.6931472, %v3845_v44 }
 0x7bf   :  { %v3849_v4 = vpop.eup %3848  ;;  %v2813_v5 = vsel %vm2797_vm0, %v3843_v57, %v2805_v0  ;;  %v2948_v58 = vmul.f32 0.6931472, %v3847_v48  ;;  %v3066_v7 = vsub.f32 %v2968_v61, %v3044_v26  ;;  %v3443_v8 = vpack.c.bf16 %v2811_v50, %v2810_v40 }
 0x7c0   :  { %v2945_v9 = vsel %vm5169_vm2, %v2942_v41, %v2939_v3  ;;  %v2957_v12 = vmul.f32 0.6931472, %v3849_v4  ;;  %v3444_v14 = vpack.c.bf16 %v2813_v5, %v2812_v63 }
 0x7c1   :  { %v2954_v42 = vsel %vm5173_vm3, %v2951_v55, %v2948_v58  ;;  %v2969_v19 = vadd.f32 %v2945_v9, %v2889_v32  ;;  %v3078_v24 = vsel %vm3070_vm12, %v3066_v7, 0.0  ;;  %v2854_v15 = vrot.slane %v3443_v8, %v4115_v49 }
 0x7c2   :  { %v2963_v20 = vsel %vm5181_vm4, %v2960_v13, %v2957_v12  ;;  %v2970_v16 = vadd.f32 %v2954_v42, %v2890_v25  ;;  %v3079_v39 = vadd.f32 %v3078_v24, %v3077_v30  ;;  %v2861_v18 = vrot.slane %v3444_v14, %v4115_v49 }
 0x7c3   :  { %v2971_v21 = vadd.f32 %v2963_v20, %v2891_v59  ;;  %v3067_v23 = vsub.f32 %v2969_v19, %v3052_v47 }
 0x7c4   :  { %v3068_v1 = vsub.f32 %v2970_v16, %v3051_v38  ;;  %v2863_v26 = vcombine.low %v2854_v15, %v2861_v18 }
 0x7c5   :  { %v3069_v27 = vsub.f32 %v2971_v21, %v3053_v6  ;;  %v3080_v28 = vsel %vm3070_vm12, %v3067_v23, 0.0 }
 0x7c6   :  { %v3081_v29 = vadd.f32 %v3080_v28, %v3079_v39  ;;  %v2877_v32 = vrot.slane %v2863_v26, %v4115_v49  ;;  %v3082_v25 = vsel %vm3070_vm12, %v3068_v1, 0.0 }
 0x7c7   :  { %v3084_v22 = vsel %vm3070_vm12, %v3069_v27, 0.0 }
 0x7c8   :  { %v3083_v30 = vadd.f32 %v3082_v25, %v3081_v29  ;;  %v2878_v33 = vcombine.low %v2870_v31, %v2877_v32 }
 0x7ca   :  { %v3085_v35 = vadd.f32 %v3084_v22, %v3083_v30  ;;  %2880 = vst [vmem:[#allocation2] sm:$0xff] %v2878_v33 }
 0x7cc   :  { %3086 = vadd.xlane.f32.xlu0 %v3085_v35 }
 0x7cd   :  { %3861 = shalt.err (!%p3858_p4)
}
 0x7ce   :  { %3118 = dma.vmem_to_hbm [thread:$0]  %s3116_s1, 128, %s5235_s18, [#allocation3]   ;;  %v3104_v49 = vpop.xlane.xlu1 %3103  ;;  %vm3107_vm5 = vcmask 1024  }
 0x7cf   :  { %v3105_v10 = vmul.f32 -0.5, %v3104_v49 }
 0x855   :  { %v3087_v11 = vpop.xlane.xlu0 %3086 }
 0x856   :  { %v3106_v17 = vadd.f32 %v3105_v10, %v3087_v11 }
 0x858   :  { %3108 = vst.msk [vmem:[%s5236_s19] sm:$0x3] %vm3107_vm5, %v3106_v17 }
 0x859   :  { %3870 = dma.done.wait [#allocation3], 128  }
 0x85a   :  { %3871 = vsyncadd [#allocation3], 4294967168 }
 0x85b   :  { %3126 = vsyncpa [#allocation3], 1 }

</bundles_post_ra>
